<compile_context>
chip_gen: v6e
topology: v6e:2x2x1
jax: 0.10.0
libtpu: 0.0.40
codegen_flags: <defaults>
</compile_context>

<pallas_src>
import functools

import jax
import jax.numpy as jnp
from jax import lax
from jax.experimental import pallas as pl
from jax.experimental.pallas import tpu as pltpu


def _round_up(x, m):
    return ((x + m - 1) // m) * m


def decoder_kernel(tablex_ref, wbig_ref, bbig_ref, wout_ref, bout_ref, h0_ref,
                   out_ref, hn_ref, *, max_len, sos_token):
    Bb, H = h0_ref.shape
    V = wout_ref.shape[1]
    P = tablex_ref.shape[1] // 3        # lane-aligned gate pitch (multiple of 128)
    W = wbig_ref.shape[1]               # Q + 3P
    Q = W - 3 * P                       # lane-aligned logits pitch
    mm_dtype = tablex_ref.dtype         # f32 (exact path) or bf16 (fast path)

    table_x = tablex_ref[...]           # (V, 3P): row v = relu(emb[v])@Wi + bi + bh_rz
    w_big = wbig_ref[...]               # (H, Q+3P): [Wout | Whr | Whz | Whn]
    w_out = wout_ref[...]               # (H, V)
    # hoisted bias broadcasts (JAX does not CSE broadcast_in_dim inside the unrolled loop)
    b_big = jnp.broadcast_to(bbig_ref[...], (Bb, W))      # [bout | 0 | 0 | bhn]
    b_out = jnp.broadcast_to(bout_ref[...], (Bb, V))

    iota_v = lax.broadcasted_iota(jnp.int32, (Bb, V), 1)
    onehot = (iota_v == sos_token).astype(mm_dtype)       # SOS one-hot (Bb, V)
    h = h0_ref[...]                                       # (Bb, H) f32

    for t in range(max_len):   # fully unrolled: max_len is a compile-time constant
        # one fused MXU op on h: logits of step t-1 AND all hidden-gate projections
        full = jnp.dot(h.astype(mm_dtype), w_big,
                       preferred_element_type=jnp.float32) + b_big       # (Bb, Q+3P)
        if t > 0:
            logits = full[:, :V]                          # logits for step t-1
            m = jnp.max(logits, axis=-1, keepdims=True)
            # greedy feedback: first maximal index (== torch.topk(1) / jnp.argmax)
            idx = jnp.min(jnp.where(logits == m, iota_v, V), axis=-1, keepdims=True)
            onehot = (iota_v == idx).astype(mm_dtype)
            # stash max-shifted raw logits; log-softmax denominator is deferred
            out_ref[:, pl.ds(t - 1, 1), :] = (logits - m)[:, None, :]
        # fused input path: embedding + ReLU + input proj + b_i* + b_hr/b_hz (one MXU op)
        gx = jnp.dot(onehot, table_x, preferred_element_type=jnp.float32)  # (Bb, 3P)
        rz = jax.nn.sigmoid(gx[:, :2 * P] + full[:, Q:Q + 2 * P])          # one EUP pass
        r = rz[:, :H]
        z = rz[:, P:P + H]
        n = jnp.tanh(gx[:, 2 * P:2 * P + H] + r * full[:, Q + 2 * P:Q + 2 * P + H])
        h = (1.0 - z) * n + z * h

    # trailing projection for the last step's logits
    logits = jnp.dot(h.astype(mm_dtype), w_out, preferred_element_type=jnp.float32) + b_out
    m = jnp.max(logits, axis=-1, keepdims=True)
    out_ref[:, pl.ds(max_len - 1, 1), :] = (logits - m)[:, None, :]

    # deferred log-softmax: buffer already holds (logits - rowmax), so only the
    # log-sum-exp pass is needed; finish with one dense full-buffer store in the
    # final (B, max_len, V) layout.
    shifted = out_ref[...]
    lse = jnp.log(jnp.sum(jnp.exp(shifted), axis=-1, keepdims=True))
    out_ref[...] = shifted - lse
    hn_ref[...] = h


def decoder_rnn_forward(params, encoder_outputs, encoder_hidden, input_mask,
                        SOS_token=0, max_len=10, matmul_dtype=jnp.float32):
    # encoder_outputs: (B, S, H); encoder_hidden: (1, B, H); input_mask unused
    # (only the batch size is taken from encoder_outputs, as in the PyTorch module).
    # TODO(synk): teacher-forcing branch (target_tensor is not None) not implemented;
    #             greedy decode path only, matching the default call.
    del input_mask
    B = encoder_outputs.shape[0]
    V, H = params["emb"].shape
    P = _round_up(H, 128)      # lane-aligned pitch per GRU gate slab
    Q = _round_up(V, 128)      # lane-aligned pitch for the fused logits slab
    h0 = encoder_hidden[0].astype(jnp.float32)                          # (B, H)

    wih, whh = params["wih_t"], params["whh_t"]
    bih, bhh = params["bih"], params["bhh"]
    wout, bout = params["wout_t"], params["bout"]

    def pad_to(a, width):      # zero-pad the last (lane) dim to `width`
        return jnp.pad(a, ((0, 0), (0, width - a.shape[-1])))

    # ---- one-time weight fusion (cheap XLA ops in the wrapper) ----
    # Input table: relu(emb) @ [Wir|Wiz|Win] + [bir+bhr | biz+bhz | bin]; gate slabs
    # at 128-lane offsets so every in-kernel slice is vreg-tile aligned.
    wi_cat = jnp.concatenate([pad_to(wih[0], P), pad_to(wih[1], P), pad_to(wih[2], P)], axis=1)
    tbl_b = jnp.concatenate([pad_to(bih[0] + bhh[0], P), pad_to(bih[1] + bhh[1], P),
                             pad_to(bih[2], P)], axis=1)
    table_x = jnp.maximum(params["emb"], 0.0) @ wi_cat + tbl_b          # (V, 3P)

    # Hidden-side fused weight [Wout | Whr | Whz | Whn] (logits slab first so the MXU
    # result FIFO delivers the greedy-feedback columns earliest) and bias [bout|0|0|bhn].
    w_big = jnp.concatenate([pad_to(wout, Q), pad_to(whh[0], P), pad_to(whh[1], P),
                             pad_to(whh[2], P)], axis=1)                # (H, Q+3P)
    b_big = jnp.concatenate([pad_to(bout, Q), jnp.zeros((1, 2 * P), jnp.float32),
                             pad_to(bhh[2], P)], axis=1)                # (1, Q+3P)

    # only the MXU operands take the (optional) bf16 cast; biases / gate math stay f32
    table_x = table_x.astype(matmul_dtype)
    w_big = w_big.astype(matmul_dtype)
    w_out = wout.astype(matmul_dtype)

    # batch-blocked grid: "parallel" lets v7x's two TensorCores run independent decode
    # chains once B grows; degenerates to a single grid step at B=2.
    bb = B if B <= 8 else 8
    assert B % bb == 0, "batch must be a multiple of the batch block"
    grid = (B // bb,)
    Wcols = Q + 3 * P

    args = (table_x, w_big, b_big, w_out, bout, h0)
    out_bytes = (B * max_len * V + B * H) * 4
    in_bytes = sum(int(a.size) * jnp.dtype(a.dtype).itemsize for a in args)
    vmem_limit = int(min(max(2 * (in_bytes + out_bytes) + (2 << 20), 16 << 20), 100 << 20))

    out_shapes = (
        jax.ShapeDtypeStruct((B, max_len, V), jnp.float32),   # final layout: no XLA transpose
        jax.ShapeDtypeStruct((B, H), jnp.float32),
    )
    # TODO(synk): at realistic vocab sizes (and on v7x's 64 MiB VMEM) table_x / w_big /
    #             the logits buffer need a vocab-tiled grid with a running max/argmax;
    #             at these shapes the fully VMEM-resident form is optimal.
    logp, h_final = pl.pallas_call(
        functools.partial(decoder_kernel, max_len=max_len, sos_token=int(SOS_token)),
        out_shape=out_shapes,
        grid=grid,
        in_specs=[
            pl.BlockSpec((V, 3 * P), lambda i: (0, 0)),       # table_x (constant block)
            pl.BlockSpec((H, Wcols), lambda i: (0, 0)),       # w_big
            pl.BlockSpec((1, Wcols), lambda i: (0, 0)),       # b_big
            pl.BlockSpec((H, V), lambda i: (0, 0)),           # w_out
            pl.BlockSpec((1, V), lambda i: (0, 0)),           # b_out
            pl.BlockSpec((bb, H), lambda i: (i, 0)),          # h0: batch-blocked
        ],
        out_specs=(
            pl.BlockSpec((bb, max_len, V), lambda i: (i, 0, 0)),
            pl.BlockSpec((bb, H), lambda i: (i, 0)),
        ),
        compiler_params=pltpu.CompilerParams(
            dimension_semantics=("parallel",),
            vmem_limit_bytes=vmem_limit),
    )(*args)

    decoder_outputs = logp                                    # (B, max_len, V)
    decoder_hidden = h_final[None]                            # (1, B, H)
    return decoder_outputs, decoder_hidden


def decoder_rnn_reference(params, encoder_outputs, encoder_hidden, max_len=10):
    """Pure-JAX reference mirroring the PyTorch module (greedy path)."""
    B = encoder_outputs.shape[0]
    h = encoder_hidden[0]
    tok = jnp.zeros((B,), dtype=jnp.int32)   # SOS_token = 0
    outs = []
    for _ in range(max_len):
        x = jnp.maximum(params["emb"][tok], 0.0)                        # (B, H)
        r = jax.nn.sigmoid(x @ params["wih_t"][0] + params["bih"][0]
                           + h @ params["whh_t"][0] + params["bhh"][0])
        z = jax.nn.sigmoid(x @ params["wih_t"][1] + params["bih"][1]
                           + h @ params["whh_t"][1] + params["bhh"][1])
        n = jnp.tanh(x @ params["wih_t"][2] + params["bih"][2]
                     + r * (h @ params["whh_t"][2] + params["bhh"][2]))
        h = (1.0 - z) * n + z * h
        logits = h @ params["wout_t"] + params["bout"]                  # (B, V)
        outs.append(logits)
        tok = jnp.argmax(logits, axis=-1).astype(jnp.int32)
    logits = jnp.stack(outs, axis=1)                                    # (B, max_len, V)
    return jax.nn.log_softmax(logits, axis=-1), h[None]


def init_params(key, hidden_size, output_size):
    ks = jax.random.split(key, 8)
    s = 1.0 / jnp.sqrt(hidden_size)
    return {
        "emb":    jax.random.normal(ks[0], (output_size, hidden_size), jnp.float32),
        "wih_t":  jax.random.uniform(ks[1], (3, hidden_size, hidden_size), jnp.float32, -s, s),
        "whh_t":  jax.random.uniform(ks[2], (3, hidden_size, hidden_size), jnp.float32, -s, s),
        "bih":    jax.random.uniform(ks[3], (3, 1, hidden_size), jnp.float32, -s, s),
        "bhh":    jax.random.uniform(ks[4], (3, 1, hidden_size), jnp.float32, -s, s),
        "wout_t": jax.random.uniform(ks[5], (hidden_size, output_size), jnp.float32, -s, s),
        "bout":   jax.random.uniform(ks[6], (1, output_size), jnp.float32, -s, s),
    }


if __name__ == "__main__":
    B, S, H, V, MAX_LEN = 2, 8, 32, 32, 10   # batch, src-seq, hidden_size, output_size (vocab)

    key = jax.random.PRNGKey(0)
    k_par, k_eo, k_eh = jax.random.split(key, 3)
    params = init_params(k_par, H, V)

    encoder_outputs = jax.random.normal(k_eo, (B, S, H), jnp.float32)
    encoder_hidden = jax.random.normal(k_eh, (1, B, H), jnp.float32)
    input_mask = jnp.ones((B, S), dtype=jnp.int32)           # unused by forward, kept for parity

    # exact (f32-matmul) path: validated against the pure-JAX reference
    log_probs, hidden = decoder_rnn_forward(params, encoder_outputs, encoder_hidden,
                                            input_mask, SOS_token=0, max_len=MAX_LEN)
    jax.block_until_ready((log_probs, hidden))

    ref_lp, ref_h = decoder_rnn_reference(params, encoder_outputs, encoder_hidden, MAX_LEN)
    assert log_probs.shape == (B, MAX_LEN, V) and hidden.shape == (1, B, H)
    assert jnp.allclose(log_probs, ref_lp, atol=1e-4, rtol=1e-4)
    assert jnp.allclose(hidden, ref_h, atol=1e-4, rtol=1e-4)

    # bf16 fast path (single-pass MXU matmuls on the serial chain). Greedy feedback is
    # discrete, so a near-tie argmax flip diverges the remaining sequence; deploy this
    # path behind an argmax-parity check vs. the f32 path. Here we only verify it
    # compiles, runs, and produces finite outputs of the right shape.
    lp_bf16, h_bf16 = decoder_rnn_forward(params, encoder_outputs, encoder_hidden,
                                          input_mask, SOS_token=0, max_len=MAX_LEN,
                                          matmul_dtype=jnp.bfloat16)
    jax.block_until_ready((lp_bf16, h_bf16))
    assert lp_bf16.shape == (B, MAX_LEN, V) and h_bf16.shape == (1, B, H)
    assert bool(jnp.isfinite(lp_bf16).all()) and bool(jnp.isfinite(h_bf16).all())

    print("KERNEL_OK")
</pallas_src>

<mosaic_0001>
module attributes {stable_mosaic.version = 11 : i64} {
  func.func @decoder_kernel(%arg0: i32, %arg1: memref<32x384xf32, #tpu.memory_space<vmem>>, %arg2: memref<32x512xf32, #tpu.memory_space<vmem>>, %arg3: memref<1x512xf32, #tpu.memory_space<vmem>>, %arg4: memref<32x32xf32, #tpu.memory_space<vmem>>, %arg5: memref<1x32xf32, #tpu.memory_space<vmem>>, %arg6: memref<2x32xf32, #tpu.memory_space<vmem>>, %arg7: memref<2x10x32xf32, #tpu.memory_space<vmem>>, %arg8: memref<2x32xf32, #tpu.memory_space<vmem>>) attributes {dimension_semantics = [#tpu.dimension_semantics<parallel>], iteration_bounds = array<i64: 1>, scalar_prefetch = 0 : i64, scratch_operands = 0 : i64, tpu.core_type = #tpu.core_type<tc>, window_params = [{pipeline_mode = #tpu.pipeline_mode<synchronous>, transform_indices = @transform_0, window_bounds = array<i64: 32, 384>}, {pipeline_mode = #tpu.pipeline_mode<synchronous>, transform_indices = @transform_1, window_bounds = array<i64: 32, 512>}, {pipeline_mode = #tpu.pipeline_mode<synchronous>, transform_indices = @transform_2, window_bounds = array<i64: 1, 512>}, {pipeline_mode = #tpu.pipeline_mode<synchronous>, transform_indices = @transform_3, window_bounds = array<i64: 32, 32>}, {pipeline_mode = #tpu.pipeline_mode<synchronous>, transform_indices = @transform_4, window_bounds = array<i64: 1, 32>}, {transform_indices = @transform_5, window_bounds = array<i64: 2, 32>}, {transform_indices = @transform_6, window_bounds = array<i64: 2, 10, 32>}, {transform_indices = @transform_7, window_bounds = array<i64: 2, 32>}]} {
    %c0 = arith.constant 0 : index
    %c0_0 = arith.constant 0 : index
    %0 = vector.load %arg1[%c0, %c0_0] : memref<32x384xf32, #tpu.memory_space<vmem>>, vector<32x384xf32>
    %c0_1 = arith.constant 0 : index
    %c0_2 = arith.constant 0 : index
    %1 = vector.load %arg2[%c0_1, %c0_2] : memref<32x512xf32, #tpu.memory_space<vmem>>, vector<32x512xf32>
    %c0_3 = arith.constant 0 : index
    %c0_4 = arith.constant 0 : index
    %2 = vector.load %arg4[%c0_3, %c0_4] : memref<32x32xf32, #tpu.memory_space<vmem>>, vector<32x32xf32>
    %c0_5 = arith.constant 0 : index
    %c0_6 = arith.constant 0 : index
    %3 = vector.load %arg3[%c0_5, %c0_6] : memref<1x512xf32, #tpu.memory_space<vmem>>, vector<1x512xf32>
    %4 = vector.shape_cast %3 : vector<1x512xf32> to vector<1x512xf32>
    %5 = vector.broadcast %4 : vector<1x512xf32> to vector<2x512xf32>
    %c0_7 = arith.constant 0 : index
    %c0_8 = arith.constant 0 : index
    %6 = vector.load %arg5[%c0_7, %c0_8] : memref<1x32xf32, #tpu.memory_space<vmem>>, vector<1x32xf32>
    %7 = vector.shape_cast %6 : vector<1x32xf32> to vector<1x32xf32>
    %8 = vector.broadcast %7 : vector<1x32xf32> to vector<2x32xf32>
    %9 = tpu.iota {dimensions = array<i32: 1>} : vector<2x32xi32>
    %c0_i32 = arith.constant 0 : i32
    %10 = vector.broadcast %c0_i32 : i32 to vector<2x32xi32>
    %11 = arith.cmpi eq, %9, %10 : vector<2x32xi32>
    %12 = arith.extui %11 : vector<2x32xi1> to vector<2x32xi32>
    %13 = arith.sitofp %12 : vector<2x32xi32> to vector<2x32xf32>
    %c0_9 = arith.constant 0 : index
    %c0_10 = arith.constant 0 : index
    %14 = vector.load %arg6[%c0_9, %c0_10] : memref<2x32xf32, #tpu.memory_space<vmem>>, vector<2x32xf32>
    %cst = arith.constant dense<0.000000e+00> : vector<2x512xf32>
    %15 = tpu.matmul %14, %1, %cst {dimension_numbers = #tpu.dot_dimension_numbers<[1], [0], [0], [1], [0, 0, 1, 1], [], []>} : vector<2x32xf32>, vector<32x512xf32>, vector<2x512xf32> -> vector<2x512xf32>
    %16 = arith.addf %15, %5 : vector<2x512xf32>
    %cst_11 = arith.constant dense<0.000000e+00> : vector<2x384xf32>
    %17 = tpu.matmul %13, %0, %cst_11 {dimension_numbers = #tpu.dot_dimension_numbers<[1], [0], [0], [1], [0, 0, 1, 1], [], []>} : vector<2x32xf32>, vector<32x384xf32>, vector<2x384xf32> -> vector<2x384xf32>
    %18 = vector.extract_strided_slice %17 {offsets = [0, 0], sizes = [2, 256], strides = [1, 1]} : vector<2x384xf32> to vector<2x256xf32>
    %19 = vector.extract_strided_slice %16 {offsets = [0, 128], sizes = [2, 256], strides = [1, 1]} : vector<2x512xf32> to vector<2x256xf32>
    %20 = arith.addf %18, %19 : vector<2x256xf32>
    %21 = arith.negf %20 : vector<2x256xf32>
    %22 = math.exp %21 : vector<2x256xf32>
    %cst_12 = arith.constant 1.000000e+00 : f32
    %23 = vector.broadcast %cst_12 : f32 to vector<2x256xf32>
    %24 = arith.addf %23, %22 : vector<2x256xf32>
    %25 = arith.divf %23, %24 : vector<2x256xf32>
    %26 = vector.extract_strided_slice %25 {offsets = [0, 0], sizes = [2, 32], strides = [1, 1]} : vector<2x256xf32> to vector<2x32xf32>
    %27 = vector.extract_strided_slice %25 {offsets = [0, 128], sizes = [2, 32], strides = [1, 1]} : vector<2x256xf32> to vector<2x32xf32>
    %28 = vector.extract_strided_slice %17 {offsets = [0, 256], sizes = [2, 32], strides = [1, 1]} : vector<2x384xf32> to vector<2x32xf32>
    %29 = vector.extract_strided_slice %16 {offsets = [0, 384], sizes = [2, 32], strides = [1, 1]} : vector<2x512xf32> to vector<2x32xf32>
    %30 = arith.mulf %26, %29 : vector<2x32xf32>
    %31 = arith.addf %28, %30 : vector<2x32xf32>
    %32 = math.tanh %31 : vector<2x32xf32>
    %cst_13 = arith.constant 1.000000e+00 : f32
    %33 = vector.broadcast %cst_13 : f32 to vector<2x32xf32>
    %34 = arith.subf %33, %27 : vector<2x32xf32>
    %35 = arith.mulf %34, %32 : vector<2x32xf32>
    %36 = arith.mulf %27, %14 : vector<2x32xf32>
    %37 = arith.addf %35, %36 : vector<2x32xf32>
    %cst_14 = arith.constant dense<0.000000e+00> : vector<2x512xf32>
    %38 = tpu.matmul %37, %1, %cst_14 {dimension_numbers = #tpu.dot_dimension_numbers<[1], [0], [0], [1], [0, 0, 1, 1], [], []>} : vector<2x32xf32>, vector<32x512xf32>, vector<2x512xf32> -> vector<2x512xf32>
    %39 = arith.addf %38, %5 : vector<2x512xf32>
    %40 = vector.extract_strided_slice %39 {offsets = [0, 0], sizes = [2, 32], strides = [1, 1]} : vector<2x512xf32> to vector<2x32xf32>
    %cst_15 = arith.constant dense<0xFF800000> : vector<2xf32>
    %41 = vector.multi_reduction <maximumf>, %40, %cst_15 [1] : vector<2x32xf32> to vector<2xf32>
    %42 = vector.shape_cast %41 : vector<2xf32> to vector<2x1xf32>
    %43 = vector.broadcast %42 : vector<2x1xf32> to vector<2x32xf32>
    %44 = arith.cmpf oeq, %40, %43 : vector<2x32xf32>
    %c32_i32 = arith.constant 32 : i32
    %45 = vector.broadcast %c32_i32 : i32 to vector<2x32xi32>
    %46 = arith.select %44, %9, %45 : vector<2x32xi1>, vector<2x32xi32>
    %cst_16 = arith.constant dense<2147483647> : vector<2xi32>
    %47 = vector.multi_reduction <minsi>, %46, %cst_16 [1] : vector<2x32xi32> to vector<2xi32>
    %48 = vector.shape_cast %47 : vector<2xi32> to vector<2x1xi32>
    %49 = vector.broadcast %48 : vector<2x1xi32> to vector<2x32xi32>
    %50 = arith.cmpi eq, %9, %49 : vector<2x32xi32>
    %51 = arith.extui %50 : vector<2x32xi1> to vector<2x32xi32>
    %52 = arith.sitofp %51 : vector<2x32xi32> to vector<2x32xf32>
    %53 = vector.broadcast %42 : vector<2x1xf32> to vector<2x32xf32>
    %54 = arith.subf %40, %53 : vector<2x32xf32>
    %55 = vector.shape_cast %54 : vector<2x32xf32> to vector<2x1x32xf32>
    %c0_17 = arith.constant 0 : index
    %c0_18 = arith.constant 0 : index
    %c0_19 = arith.constant 0 : index
    %56 = vector.load %arg7[%c0_17, %c0_18, %c0_19] : memref<2x10x32xf32, #tpu.memory_space<vmem>>, vector<2x1x32xf32>
    tpu.vector_store %arg7[%c0_17, %c0_18, %c0_19], %55 {strides = array<i32>} : memref<2x10x32xf32, #tpu.memory_space<vmem>>, vector<2x1x32xf32>,
    %cst_20 = arith.constant dense<0.000000e+00> : vector<2x384xf32>
    %57 = tpu.matmul %52, %0, %cst_20 {dimension_numbers = #tpu.dot_dimension_numbers<[1], [0], [0], [1], [0, 0, 1, 1], [], []>} : vector<2x32xf32>, vector<32x384xf32>, vector<2x384xf32> -> vector<2x384xf32>
    %58 = vector.extract_strided_slice %57 {offsets = [0, 0], sizes = [2, 256], strides = [1, 1]} : vector<2x384xf32> to vector<2x256xf32>
    %59 = vector.extract_strided_slice %39 {offsets = [0, 128], sizes = [2, 256], strides = [1, 1]} : vector<2x512xf32> to vector<2x256xf32>
    %60 = arith.addf %58, %59 : vector<2x256xf32>
    %61 = arith.negf %60 : vector<2x256xf32>
    %62 = math.exp %61 : vector<2x256xf32>
    %cst_21 = arith.constant 1.000000e+00 : f32
    %63 = vector.broadcast %cst_21 : f32 to vector<2x256xf32>
    %64 = arith.addf %63, %62 : vector<2x256xf32>
    %65 = arith.divf %63, %64 : vector<2x256xf32>
    %66 = vector.extract_strided_slice %65 {offsets = [0, 0], sizes = [2, 32], strides = [1, 1]} : vector<2x256xf32> to vector<2x32xf32>
    %67 = vector.extract_strided_slice %65 {offsets = [0, 128], sizes = [2, 32], strides = [1, 1]} : vector<2x256xf32> to vector<2x32xf32>
    %68 = vector.extract_strided_slice %57 {offsets = [0, 256], sizes = [2, 32], strides = [1, 1]} : vector<2x384xf32> to vector<2x32xf32>
    %69 = vector.extract_strided_slice %39 {offsets = [0, 384], sizes = [2, 32], strides = [1, 1]} : vector<2x512xf32> to vector<2x32xf32>
    %70 = arith.mulf %66, %69 : vector<2x32xf32>
    %71 = arith.addf %68, %70 : vector<2x32xf32>
    %72 = math.tanh %71 : vector<2x32xf32>
    %cst_22 = arith.constant 1.000000e+00 : f32
    %73 = vector.broadcast %cst_22 : f32 to vector<2x32xf32>
    %74 = arith.subf %73, %67 : vector<2x32xf32>
    %75 = arith.mulf %74, %72 : vector<2x32xf32>
    %76 = arith.mulf %67, %37 : vector<2x32xf32>
    %77 = arith.addf %75, %76 : vector<2x32xf32>
    %cst_23 = arith.constant dense<0.000000e+00> : vector<2x512xf32>
    %78 = tpu.matmul %77, %1, %cst_23 {dimension_numbers = #tpu.dot_dimension_numbers<[1], [0], [0], [1], [0, 0, 1, 1], [], []>} : vector<2x32xf32>, vector<32x512xf32>, vector<2x512xf32> -> vector<2x512xf32>
    %79 = arith.addf %78, %5 : vector<2x512xf32>
    %80 = vector.extract_strided_slice %79 {offsets = [0, 0], sizes = [2, 32], strides = [1, 1]} : vector<2x512xf32> to vector<2x32xf32>
    %cst_24 = arith.constant dense<0xFF800000> : vector<2xf32>
    %81 = vector.multi_reduction <maximumf>, %80, %cst_24 [1] : vector<2x32xf32> to vector<2xf32>
    %82 = vector.shape_cast %81 : vector<2xf32> to vector<2x1xf32>
    %83 = vector.broadcast %82 : vector<2x1xf32> to vector<2x32xf32>
    %84 = arith.cmpf oeq, %80, %83 : vector<2x32xf32>
    %c32_i32_25 = arith.constant 32 : i32
    %85 = vector.broadcast %c32_i32_25 : i32 to vector<2x32xi32>
    %86 = arith.select %84, %9, %85 : vector<2x32xi1>, vector<2x32xi32>
    %cst_26 = arith.constant dense<2147483647> : vector<2xi32>
    %87 = vector.multi_reduction <minsi>, %86, %cst_26 [1] : vector<2x32xi32> to vector<2xi32>
    %88 = vector.shape_cast %87 : vector<2xi32> to vector<2x1xi32>
    %89 = vector.broadcast %88 : vector<2x1xi32> to vector<2x32xi32>
    %90 = arith.cmpi eq, %9, %89 : vector<2x32xi32>
    %91 = arith.extui %90 : vector<2x32xi1> to vector<2x32xi32>
    %92 = arith.sitofp %91 : vector<2x32xi32> to vector<2x32xf32>
    %93 = vector.broadcast %82 : vector<2x1xf32> to vector<2x32xf32>
    %94 = arith.subf %80, %93 : vector<2x32xf32>
    %95 = vector.shape_cast %94 : vector<2x32xf32> to vector<2x1x32xf32>
    %c0_27 = arith.constant 0 : index
    %c1 = arith.constant 1 : index
    %c0_28 = arith.constant 0 : index
    %96 = vector.load %arg7[%c0_27, %c1, %c0_28] : memref<2x10x32xf32, #tpu.memory_space<vmem>>, vector<2x1x32xf32>
    tpu.vector_store %arg7[%c0_27, %c1, %c0_28], %95 {strides = array<i32>} : memref<2x10x32xf32, #tpu.memory_space<vmem>>, vector<2x1x32xf32>,
    %cst_29 = arith.constant dense<0.000000e+00> : vector<2x384xf32>
    %97 = tpu.matmul %92, %0, %cst_29 {dimension_numbers = #tpu.dot_dimension_numbers<[1], [0], [0], [1], [0, 0, 1, 1], [], []>} : vector<2x32xf32>, vector<32x384xf32>, vector<2x384xf32> -> vector<2x384xf32>
    %98 = vector.extract_strided_slice %97 {offsets = [0, 0], sizes = [2, 256], strides = [1, 1]} : vector<2x384xf32> to vector<2x256xf32>
    %99 = vector.extract_strided_slice %79 {offsets = [0, 128], sizes = [2, 256], strides = [1, 1]} : vector<2x512xf32> to vector<2x256xf32>
    %100 = arith.addf %98, %99 : vector<2x256xf32>
    %101 = arith.negf %100 : vector<2x256xf32>
    %102 = math.exp %101 : vector<2x256xf32>
    %cst_30 = arith.constant 1.000000e+00 : f32
    %103 = vector.broadcast %cst_30 : f32 to vector<2x256xf32>
    %104 = arith.addf %103, %102 : vector<2x256xf32>
    %105 = arith.divf %103, %104 : vector<2x256xf32>
    %106 = vector.extract_strided_slice %105 {offsets = [0, 0], sizes = [2, 32], strides = [1, 1]} : vector<2x256xf32> to vector<2x32xf32>
    %107 = vector.extract_strided_slice %105 {offsets = [0, 128], sizes = [2, 32], strides = [1, 1]} : vector<2x256xf32> to vector<2x32xf32>
    %108 = vector.extract_strided_slice %97 {offsets = [0, 256], sizes = [2, 32], strides = [1, 1]} : vector<2x384xf32> to vector<2x32xf32>
    %109 = vector.extract_strided_slice %79 {offsets = [0, 384], sizes = [2, 32], strides = [1, 1]} : vector<2x512xf32> to vector<2x32xf32>
    %110 = arith.mulf %106, %109 : vector<2x32xf32>
    %111 = arith.addf %108, %110 : vector<2x32xf32>
    %112 = math.tanh %111 : vector<2x32xf32>
    %cst_31 = arith.constant 1.000000e+00 : f32
    %113 = vector.broadcast %cst_31 : f32 to vector<2x32xf32>
    %114 = arith.subf %113, %107 : vector<2x32xf32>
    %115 = arith.mulf %114, %112 : vector<2x32xf32>
    %116 = arith.mulf %107, %77 : vector<2x32xf32>
    %117 = arith.addf %115, %116 : vector<2x32xf32>
    %cst_32 = arith.constant dense<0.000000e+00> : vector<2x512xf32>
    %118 = tpu.matmul %117, %1, %cst_32 {dimension_numbers = #tpu.dot_dimension_numbers<[1], [0], [0], [1], [0, 0, 1, 1], [], []>} : vector<2x32xf32>, vector<32x512xf32>, vector<2x512xf32> -> vector<2x512xf32>
    %119 = arith.addf %118, %5 : vector<2x512xf32>
    %120 = vector.extract_strided_slice %119 {offsets = [0, 0], sizes = [2, 32], strides = [1, 1]} : vector<2x512xf32> to vector<2x32xf32>
    %cst_33 = arith.constant dense<0xFF800000> : vector<2xf32>
    %121 = vector.multi_reduction <maximumf>, %120, %cst_33 [1] : vector<2x32xf32> to vector<2xf32>
    %122 = vector.shape_cast %121 : vector<2xf32> to vector<2x1xf32>
    %123 = vector.broadcast %122 : vector<2x1xf32> to vector<2x32xf32>
    %124 = arith.cmpf oeq, %120, %123 : vector<2x32xf32>
    %c32_i32_34 = arith.constant 32 : i32
    %125 = vector.broadcast %c32_i32_34 : i32 to vector<2x32xi32>
    %126 = arith.select %124, %9, %125 : vector<2x32xi1>, vector<2x32xi32>
    %cst_35 = arith.constant dense<2147483647> : vector<2xi32>
    %127 = vector.multi_reduction <minsi>, %126, %cst_35 [1] : vector<2x32xi32> to vector<2xi32>
    %128 = vector.shape_cast %127 : vector<2xi32> to vector<2x1xi32>
    %129 = vector.broadcast %128 : vector<2x1xi32> to vector<2x32xi32>
    %130 = arith.cmpi eq, %9, %129 : vector<2x32xi32>
    %131 = arith.extui %130 : vector<2x32xi1> to vector<2x32xi32>
    %132 = arith.sitofp %131 : vector<2x32xi32> to vector<2x32xf32>
    %133 = vector.broadcast %122 : vector<2x1xf32> to vector<2x32xf32>
    %134 = arith.subf %120, %133 : vector<2x32xf32>
    %135 = vector.shape_cast %134 : vector<2x32xf32> to vector<2x1x32xf32>
    %c0_36 = arith.constant 0 : index
    %c2 = arith.constant 2 : index
    %c0_37 = arith.constant 0 : index
    %136 = vector.load %arg7[%c0_36, %c2, %c0_37] : memref<2x10x32xf32, #tpu.memory_space<vmem>>, vector<2x1x32xf32>
    tpu.vector_store %arg7[%c0_36, %c2, %c0_37], %135 {strides = array<i32>} : memref<2x10x32xf32, #tpu.memory_space<vmem>>, vector<2x1x32xf32>,
    %cst_38 = arith.constant dense<0.000000e+00> : vector<2x384xf32>
    %137 = tpu.matmul %132, %0, %cst_38 {dimension_numbers = #tpu.dot_dimension_numbers<[1], [0], [0], [1], [0, 0, 1, 1], [], []>} : vector<2x32xf32>, vector<32x384xf32>, vector<2x384xf32> -> vector<2x384xf32>
    %138 = vector.extract_strided_slice %137 {offsets = [0, 0], sizes = [2, 256], strides = [1, 1]} : vector<2x384xf32> to vector<2x256xf32>
    %139 = vector.extract_strided_slice %119 {offsets = [0, 128], sizes = [2, 256], strides = [1, 1]} : vector<2x512xf32> to vector<2x256xf32>
    %140 = arith.addf %138, %139 : vector<2x256xf32>
    %141 = arith.negf %140 : vector<2x256xf32>
    %142 = math.exp %141 : vector<2x256xf32>
    %cst_39 = arith.constant 1.000000e+00 : f32
    %143 = vector.broadcast %cst_39 : f32 to vector<2x256xf32>
    %144 = arith.addf %143, %142 : vector<2x256xf32>
    %145 = arith.divf %143, %144 : vector<2x256xf32>
    %146 = vector.extract_strided_slice %145 {offsets = [0, 0], sizes = [2, 32], strides = [1, 1]} : vector<2x256xf32> to vector<2x32xf32>
    %147 = vector.extract_strided_slice %145 {offsets = [0, 128], sizes = [2, 32], strides = [1, 1]} : vector<2x256xf32> to vector<2x32xf32>
    %148 = vector.extract_strided_slice %137 {offsets = [0, 256], sizes = [2, 32], strides = [1, 1]} : vector<2x384xf32> to vector<2x32xf32>
    %149 = vector.extract_strided_slice %119 {offsets = [0, 384], sizes = [2, 32], strides = [1, 1]} : vector<2x512xf32> to vector<2x32xf32>
    %150 = arith.mulf %146, %149 : vector<2x32xf32>
    %151 = arith.addf %148, %150 : vector<2x32xf32>
    %152 = math.tanh %151 : vector<2x32xf32>
    %cst_40 = arith.constant 1.000000e+00 : f32
    %153 = vector.broadcast %cst_40 : f32 to vector<2x32xf32>
    %154 = arith.subf %153, %147 : vector<2x32xf32>
    %155 = arith.mulf %154, %152 : vector<2x32xf32>
    %156 = arith.mulf %147, %117 : vector<2x32xf32>
    %157 = arith.addf %155, %156 : vector<2x32xf32>
    %cst_41 = arith.constant dense<0.000000e+00> : vector<2x512xf32>
    %158 = tpu.matmul %157, %1, %cst_41 {dimension_numbers = #tpu.dot_dimension_numbers<[1], [0], [0], [1], [0, 0, 1, 1], [], []>} : vector<2x32xf32>, vector<32x512xf32>, vector<2x512xf32> -> vector<2x512xf32>
    %159 = arith.addf %158, %5 : vector<2x512xf32>
    %160 = vector.extract_strided_slice %159 {offsets = [0, 0], sizes = [2, 32], strides = [1, 1]} : vector<2x512xf32> to vector<2x32xf32>
    %cst_42 = arith.constant dense<0xFF800000> : vector<2xf32>
    %161 = vector.multi_reduction <maximumf>, %160, %cst_42 [1] : vector<2x32xf32> to vector<2xf32>
    %162 = vector.shape_cast %161 : vector<2xf32> to vector<2x1xf32>
    %163 = vector.broadcast %162 : vector<2x1xf32> to vector<2x32xf32>
    %164 = arith.cmpf oeq, %160, %163 : vector<2x32xf32>
    %c32_i32_43 = arith.constant 32 : i32
    %165 = vector.broadcast %c32_i32_43 : i32 to vector<2x32xi32>
    %166 = arith.select %164, %9, %165 : vector<2x32xi1>, vector<2x32xi32>
    %cst_44 = arith.constant dense<2147483647> : vector<2xi32>
    %167 = vector.multi_reduction <minsi>, %166, %cst_44 [1] : vector<2x32xi32> to vector<2xi32>
    %168 = vector.shape_cast %167 : vector<2xi32> to vector<2x1xi32>
    %169 = vector.broadcast %168 : vector<2x1xi32> to vector<2x32xi32>
    %170 = arith.cmpi eq, %9, %169 : vector<2x32xi32>
    %171 = arith.extui %170 : vector<2x32xi1> to vector<2x32xi32>
    %172 = arith.sitofp %171 : vector<2x32xi32> to vector<2x32xf32>
    %173 = vector.broadcast %162 : vector<2x1xf32> to vector<2x32xf32>
    %174 = arith.subf %160, %173 : vector<2x32xf32>
    %175 = vector.shape_cast %174 : vector<2x32xf32> to vector<2x1x32xf32>
    %c0_45 = arith.constant 0 : index
    %c3 = arith.constant 3 : index
    %c0_46 = arith.constant 0 : index
    %176 = vector.load %arg7[%c0_45, %c3, %c0_46] : memref<2x10x32xf32, #tpu.memory_space<vmem>>, vector<2x1x32xf32>
    tpu.vector_store %arg7[%c0_45, %c3, %c0_46], %175 {strides = array<i32>} : memref<2x10x32xf32, #tpu.memory_space<vmem>>, vector<2x1x32xf32>,
    %cst_47 = arith.constant dense<0.000000e+00> : vector<2x384xf32>
    %177 = tpu.matmul %172, %0, %cst_47 {dimension_numbers = #tpu.dot_dimension_numbers<[1], [0], [0], [1], [0, 0, 1, 1], [], []>} : vector<2x32xf32>, vector<32x384xf32>, vector<2x384xf32> -> vector<2x384xf32>
    %178 = vector.extract_strided_slice %177 {offsets = [0, 0], sizes = [2, 256], strides = [1, 1]} : vector<2x384xf32> to vector<2x256xf32>
    %179 = vector.extract_strided_slice %159 {offsets = [0, 128], sizes = [2, 256], strides = [1, 1]} : vector<2x512xf32> to vector<2x256xf32>
    %180 = arith.addf %178, %179 : vector<2x256xf32>
    %181 = arith.negf %180 : vector<2x256xf32>
    %182 = math.exp %181 : vector<2x256xf32>
    %cst_48 = arith.constant 1.000000e+00 : f32
    %183 = vector.broadcast %cst_48 : f32 to vector<2x256xf32>
    %184 = arith.addf %183, %182 : vector<2x256xf32>
    %185 = arith.divf %183, %184 : vector<2x256xf32>
    %186 = vector.extract_strided_slice %185 {offsets = [0, 0], sizes = [2, 32], strides = [1, 1]} : vector<2x256xf32> to vector<2x32xf32>
    %187 = vector.extract_strided_slice %185 {offsets = [0, 128], sizes = [2, 32], strides = [1, 1]} : vector<2x256xf32> to vector<2x32xf32>
    %188 = vector.extract_strided_slice %177 {offsets = [0, 256], sizes = [2, 32], strides = [1, 1]} : vector<2x384xf32> to vector<2x32xf32>
    %189 = vector.extract_strided_slice %159 {offsets = [0, 384], sizes = [2, 32], strides = [1, 1]} : vector<2x512xf32> to vector<2x32xf32>
    %190 = arith.mulf %186, %189 : vector<2x32xf32>
    %191 = arith.addf %188, %190 : vector<2x32xf32>
    %192 = math.tanh %191 : vector<2x32xf32>
    %cst_49 = arith.constant 1.000000e+00 : f32
    %193 = vector.broadcast %cst_49 : f32 to vector<2x32xf32>
    %194 = arith.subf %193, %187 : vector<2x32xf32>
    %195 = arith.mulf %194, %192 : vector<2x32xf32>
    %196 = arith.mulf %187, %157 : vector<2x32xf32>
    %197 = arith.addf %195, %196 : vector<2x32xf32>
    %cst_50 = arith.constant dense<0.000000e+00> : vector<2x512xf32>
    %198 = tpu.matmul %197, %1, %cst_50 {dimension_numbers = #tpu.dot_dimension_numbers<[1], [0], [0], [1], [0, 0, 1, 1], [], []>} : vector<2x32xf32>, vector<32x512xf32>, vector<2x512xf32> -> vector<2x512xf32>
    %199 = arith.addf %198, %5 : vector<2x512xf32>
    %200 = vector.extract_strided_slice %199 {offsets = [0, 0], sizes = [2, 32], strides = [1, 1]} : vector<2x512xf32> to vector<2x32xf32>
    %cst_51 = arith.constant dense<0xFF800000> : vector<2xf32>
    %201 = vector.multi_reduction <maximumf>, %200, %cst_51 [1] : vector<2x32xf32> to vector<2xf32>
    %202 = vector.shape_cast %201 : vector<2xf32> to vector<2x1xf32>
    %203 = vector.broadcast %202 : vector<2x1xf32> to vector<2x32xf32>
    %204 = arith.cmpf oeq, %200, %203 : vector<2x32xf32>
    %c32_i32_52 = arith.constant 32 : i32
    %205 = vector.broadcast %c32_i32_52 : i32 to vector<2x32xi32>
    %206 = arith.select %204, %9, %205 : vector<2x32xi1>, vector<2x32xi32>
    %cst_53 = arith.constant dense<2147483647> : vector<2xi32>
    %207 = vector.multi_reduction <minsi>, %206, %cst_53 [1] : vector<2x32xi32> to vector<2xi32>
    %208 = vector.shape_cast %207 : vector<2xi32> to vector<2x1xi32>
    %209 = vector.broadcast %208 : vector<2x1xi32> to vector<2x32xi32>
    %210 = arith.cmpi eq, %9, %209 : vector<2x32xi32>
    %211 = arith.extui %210 : vector<2x32xi1> to vector<2x32xi32>
    %212 = arith.sitofp %211 : vector<2x32xi32> to vector<2x32xf32>
    %213 = vector.broadcast %202 : vector<2x1xf32> to vector<2x32xf32>
    %214 = arith.subf %200, %213 : vector<2x32xf32>
    %215 = vector.shape_cast %214 : vector<2x32xf32> to vector<2x1x32xf32>
    %c0_54 = arith.constant 0 : index
    %c4 = arith.constant 4 : index
    %c0_55 = arith.constant 0 : index
    %216 = vector.load %arg7[%c0_54, %c4, %c0_55] : memref<2x10x32xf32, #tpu.memory_space<vmem>>, vector<2x1x32xf32>
    tpu.vector_store %arg7[%c0_54, %c4, %c0_55], %215 {strides = array<i32>} : memref<2x10x32xf32, #tpu.memory_space<vmem>>, vector<2x1x32xf32>,
    %cst_56 = arith.constant dense<0.000000e+00> : vector<2x384xf32>
    %217 = tpu.matmul %212, %0, %cst_56 {dimension_numbers = #tpu.dot_dimension_numbers<[1], [0], [0], [1], [0, 0, 1, 1], [], []>} : vector<2x32xf32>, vector<32x384xf32>, vector<2x384xf32> -> vector<2x384xf32>
    %218 = vector.extract_strided_slice %217 {offsets = [0, 0], sizes = [2, 256], strides = [1, 1]} : vector<2x384xf32> to vector<2x256xf32>
    %219 = vector.extract_strided_slice %199 {offsets = [0, 128], sizes = [2, 256], strides = [1, 1]} : vector<2x512xf32> to vector<2x256xf32>
    %220 = arith.addf %218, %219 : vector<2x256xf32>
    %221 = arith.negf %220 : vector<2x256xf32>
    %222 = math.exp %221 : vector<2x256xf32>
    %cst_57 = arith.constant 1.000000e+00 : f32
    %223 = vector.broadcast %cst_57 : f32 to vector<2x256xf32>
    %224 = arith.addf %223, %222 : vector<2x256xf32>
    %225 = arith.divf %223, %224 : vector<2x256xf32>
    %226 = vector.extract_strided_slice %225 {offsets = [0, 0], sizes = [2, 32], strides = [1, 1]} : vector<2x256xf32> to vector<2x32xf32>
    %227 = vector.extract_strided_slice %225 {offsets = [0, 128], sizes = [2, 32], strides = [1, 1]} : vector<2x256xf32> to vector<2x32xf32>
    %228 = vector.extract_strided_slice %217 {offsets = [0, 256], sizes = [2, 32], strides = [1, 1]} : vector<2x384xf32> to vector<2x32xf32>
    %229 = vector.extract_strided_slice %199 {offsets = [0, 384], sizes = [2, 32], strides = [1, 1]} : vector<2x512xf32> to vector<2x32xf32>
    %230 = arith.mulf %226, %229 : vector<2x32xf32>
    %231 = arith.addf %228, %230 : vector<2x32xf32>
    %232 = math.tanh %231 : vector<2x32xf32>
    %cst_58 = arith.constant 1.000000e+00 : f32
    %233 = vector.broadcast %cst_58 : f32 to vector<2x32xf32>
    %234 = arith.subf %233, %227 : vector<2x32xf32>
    %235 = arith.mulf %234, %232 : vector<2x32xf32>
    %236 = arith.mulf %227, %197 : vector<2x32xf32>
    %237 = arith.addf %235, %236 : vector<2x32xf32>
    %cst_59 = arith.constant dense<0.000000e+00> : vector<2x512xf32>
    %238 = tpu.matmul %237, %1, %cst_59 {dimension_numbers = #tpu.dot_dimension_numbers<[1], [0], [0], [1], [0, 0, 1, 1], [], []>} : vector<2x32xf32>, vector<32x512xf32>, vector<2x512xf32> -> vector<2x512xf32>
    %239 = arith.addf %238, %5 : vector<2x512xf32>
    %240 = vector.extract_strided_slice %239 {offsets = [0, 0], sizes = [2, 32], strides = [1, 1]} : vector<2x512xf32> to vector<2x32xf32>
    %cst_60 = arith.constant dense<0xFF800000> : vector<2xf32>
    %241 = vector.multi_reduction <maximumf>, %240, %cst_60 [1] : vector<2x32xf32> to vector<2xf32>
    %242 = vector.shape_cast %241 : vector<2xf32> to vector<2x1xf32>
    %243 = vector.broadcast %242 : vector<2x1xf32> to vector<2x32xf32>
    %244 = arith.cmpf oeq, %240, %243 : vector<2x32xf32>
    %c32_i32_61 = arith.constant 32 : i32
    %245 = vector.broadcast %c32_i32_61 : i32 to vector<2x32xi32>
    %246 = arith.select %244, %9, %245 : vector<2x32xi1>, vector<2x32xi32>
    %cst_62 = arith.constant dense<2147483647> : vector<2xi32>
    %247 = vector.multi_reduction <minsi>, %246, %cst_62 [1] : vector<2x32xi32> to vector<2xi32>
    %248 = vector.shape_cast %247 : vector<2xi32> to vector<2x1xi32>
    %249 = vector.broadcast %248 : vector<2x1xi32> to vector<2x32xi32>
    %250 = arith.cmpi eq, %9, %249 : vector<2x32xi32>
    %251 = arith.extui %250 : vector<2x32xi1> to vector<2x32xi32>
    %252 = arith.sitofp %251 : vector<2x32xi32> to vector<2x32xf32>
    %253 = vector.broadcast %242 : vector<2x1xf32> to vector<2x32xf32>
    %254 = arith.subf %240, %253 : vector<2x32xf32>
    %255 = vector.shape_cast %254 : vector<2x32xf32> to vector<2x1x32xf32>
    %c0_63 = arith.constant 0 : index
    %c5 = arith.constant 5 : index
    %c0_64 = arith.constant 0 : index
    %256 = vector.load %arg7[%c0_63, %c5, %c0_64] : memref<2x10x32xf32, #tpu.memory_space<vmem>>, vector<2x1x32xf32>
    tpu.vector_store %arg7[%c0_63, %c5, %c0_64], %255 {strides = array<i32>} : memref<2x10x32xf32, #tpu.memory_space<vmem>>, vector<2x1x32xf32>,
    %cst_65 = arith.constant dense<0.000000e+00> : vector<2x384xf32>
    %257 = tpu.matmul %252, %0, %cst_65 {dimension_numbers = #tpu.dot_dimension_numbers<[1], [0], [0], [1], [0, 0, 1, 1], [], []>} : vector<2x32xf32>, vector<32x384xf32>, vector<2x384xf32> -> vector<2x384xf32>
    %258 = vector.extract_strided_slice %257 {offsets = [0, 0], sizes = [2, 256], strides = [1, 1]} : vector<2x384xf32> to vector<2x256xf32>
    %259 = vector.extract_strided_slice %239 {offsets = [0, 128], sizes = [2, 256], strides = [1, 1]} : vector<2x512xf32> to vector<2x256xf32>
    %260 = arith.addf %258, %259 : vector<2x256xf32>
    %261 = arith.negf %260 : vector<2x256xf32>
    %262 = math.exp %261 : vector<2x256xf32>
    %cst_66 = arith.constant 1.000000e+00 : f32
    %263 = vector.broadcast %cst_66 : f32 to vector<2x256xf32>
    %264 = arith.addf %263, %262 : vector<2x256xf32>
    %265 = arith.divf %263, %264 : vector<2x256xf32>
    %266 = vector.extract_strided_slice %265 {offsets = [0, 0], sizes = [2, 32], strides = [1, 1]} : vector<2x256xf32> to vector<2x32xf32>
    %267 = vector.extract_strided_slice %265 {offsets = [0, 128], sizes = [2, 32], strides = [1, 1]} : vector<2x256xf32> to vector<2x32xf32>
    %268 = vector.extract_strided_slice %257 {offsets = [0, 256], sizes = [2, 32], strides = [1, 1]} : vector<2x384xf32> to vector<2x32xf32>
    %269 = vector.extract_strided_slice %239 {offsets = [0, 384], sizes = [2, 32], strides = [1, 1]} : vector<2x512xf32> to vector<2x32xf32>
    %270 = arith.mulf %266, %269 : vector<2x32xf32>
    %271 = arith.addf %268, %270 : vector<2x32xf32>
    %272 = math.tanh %271 : vector<2x32xf32>
    %cst_67 = arith.constant 1.000000e+00 : f32
    %273 = vector.broadcast %cst_67 : f32 to vector<2x32xf32>
    %274 = arith.subf %273, %267 : vector<2x32xf32>
    %275 = arith.mulf %274, %272 : vector<2x32xf32>
    %276 = arith.mulf %267, %237 : vector<2x32xf32>
    %277 = arith.addf %275, %276 : vector<2x32xf32>
    %cst_68 = arith.constant dense<0.000000e+00> : vector<2x512xf32>
    %278 = tpu.matmul %277, %1, %cst_68 {dimension_numbers = #tpu.dot_dimension_numbers<[1], [0], [0], [1], [0, 0, 1, 1], [], []>} : vector<2x32xf32>, vector<32x512xf32>, vector<2x512xf32> -> vector<2x512xf32>
    %279 = arith.addf %278, %5 : vector<2x512xf32>
    %280 = vector.extract_strided_slice %279 {offsets = [0, 0], sizes = [2, 32], strides = [1, 1]} : vector<2x512xf32> to vector<2x32xf32>
    %cst_69 = arith.constant dense<0xFF800000> : vector<2xf32>
    %281 = vector.multi_reduction <maximumf>, %280, %cst_69 [1] : vector<2x32xf32> to vector<2xf32>
    %282 = vector.shape_cast %281 : vector<2xf32> to vector<2x1xf32>
    %283 = vector.broadcast %282 : vector<2x1xf32> to vector<2x32xf32>
    %284 = arith.cmpf oeq, %280, %283 : vector<2x32xf32>
    %c32_i32_70 = arith.constant 32 : i32
    %285 = vector.broadcast %c32_i32_70 : i32 to vector<2x32xi32>
    %286 = arith.select %284, %9, %285 : vector<2x32xi1>, vector<2x32xi32>
    %cst_71 = arith.constant dense<2147483647> : vector<2xi32>
    %287 = vector.multi_reduction <minsi>, %286, %cst_71 [1] : vector<2x32xi32> to vector<2xi32>
    %288 = vector.shape_cast %287 : vector<2xi32> to vector<2x1xi32>
    %289 = vector.broadcast %288 : vector<2x1xi32> to vector<2x32xi32>
    %290 = arith.cmpi eq, %9, %289 : vector<2x32xi32>
    %291 = arith.extui %290 : vector<2x32xi1> to vector<2x32xi32>
    %292 = arith.sitofp %291 : vector<2x32xi32> to vector<2x32xf32>
    %293 = vector.broadcast %282 : vector<2x1xf32> to vector<2x32xf32>
    %294 = arith.subf %280, %293 : vector<2x32xf32>
    %295 = vector.shape_cast %294 : vector<2x32xf32> to vector<2x1x32xf32>
    %c0_72 = arith.constant 0 : index
    %c6 = arith.constant 6 : index
    %c0_73 = arith.constant 0 : index
    %296 = vector.load %arg7[%c0_72, %c6, %c0_73] : memref<2x10x32xf32, #tpu.memory_space<vmem>>, vector<2x1x32xf32>
    tpu.vector_store %arg7[%c0_72, %c6, %c0_73], %295 {strides = array<i32>} : memref<2x10x32xf32, #tpu.memory_space<vmem>>, vector<2x1x32xf32>,
    %cst_74 = arith.constant dense<0.000000e+00> : vector<2x384xf32>
    %297 = tpu.matmul %292, %0, %cst_74 {dimension_numbers = #tpu.dot_dimension_numbers<[1], [0], [0], [1], [0, 0, 1, 1], [], []>} : vector<2x32xf32>, vector<32x384xf32>, vector<2x384xf32> -> vector<2x384xf32>
    %298 = vector.extract_strided_slice %297 {offsets = [0, 0], sizes = [2, 256], strides = [1, 1]} : vector<2x384xf32> to vector<2x256xf32>
    %299 = vector.extract_strided_slice %279 {offsets = [0, 128], sizes = [2, 256], strides = [1, 1]} : vector<2x512xf32> to vector<2x256xf32>
    %300 = arith.addf %298, %299 : vector<2x256xf32>
    %301 = arith.negf %300 : vector<2x256xf32>
    %302 = math.exp %301 : vector<2x256xf32>
    %cst_75 = arith.constant 1.000000e+00 : f32
    %303 = vector.broadcast %cst_75 : f32 to vector<2x256xf32>
    %304 = arith.addf %303, %302 : vector<2x256xf32>
    %305 = arith.divf %303, %304 : vector<2x256xf32>
    %306 = vector.extract_strided_slice %305 {offsets = [0, 0], sizes = [2, 32], strides = [1, 1]} : vector<2x256xf32> to vector<2x32xf32>
    %307 = vector.extract_strided_slice %305 {offsets = [0, 128], sizes = [2, 32], strides = [1, 1]} : vector<2x256xf32> to vector<2x32xf32>
    %308 = vector.extract_strided_slice %297 {offsets = [0, 256], sizes = [2, 32], strides = [1, 1]} : vector<2x384xf32> to vector<2x32xf32>
    %309 = vector.extract_strided_slice %279 {offsets = [0, 384], sizes = [2, 32], strides = [1, 1]} : vector<2x512xf32> to vector<2x32xf32>
    %310 = arith.mulf %306, %309 : vector<2x32xf32>
    %311 = arith.addf %308, %310 : vector<2x32xf32>
    %312 = math.tanh %311 : vector<2x32xf32>
    %cst_76 = arith.constant 1.000000e+00 : f32
    %313 = vector.broadcast %cst_76 : f32 to vector<2x32xf32>
    %314 = arith.subf %313, %307 : vector<2x32xf32>
    %315 = arith.mulf %314, %312 : vector<2x32xf32>
    %316 = arith.mulf %307, %277 : vector<2x32xf32>
    %317 = arith.addf %315, %316 : vector<2x32xf32>
    %cst_77 = arith.constant dense<0.000000e+00> : vector<2x512xf32>
    %318 = tpu.matmul %317, %1, %cst_77 {dimension_numbers = #tpu.dot_dimension_numbers<[1], [0], [0], [1], [0, 0, 1, 1], [], []>} : vector<2x32xf32>, vector<32x512xf32>, vector<2x512xf32> -> vector<2x512xf32>
    %319 = arith.addf %318, %5 : vector<2x512xf32>
    %320 = vector.extract_strided_slice %319 {offsets = [0, 0], sizes = [2, 32], strides = [1, 1]} : vector<2x512xf32> to vector<2x32xf32>
    %cst_78 = arith.constant dense<0xFF800000> : vector<2xf32>
    %321 = vector.multi_reduction <maximumf>, %320, %cst_78 [1] : vector<2x32xf32> to vector<2xf32>
    %322 = vector.shape_cast %321 : vector<2xf32> to vector<2x1xf32>
    %323 = vector.broadcast %322 : vector<2x1xf32> to vector<2x32xf32>
    %324 = arith.cmpf oeq, %320, %323 : vector<2x32xf32>
    %c32_i32_79 = arith.constant 32 : i32
    %325 = vector.broadcast %c32_i32_79 : i32 to vector<2x32xi32>
    %326 = arith.select %324, %9, %325 : vector<2x32xi1>, vector<2x32xi32>
    %cst_80 = arith.constant dense<2147483647> : vector<2xi32>
    %327 = vector.multi_reduction <minsi>, %326, %cst_80 [1] : vector<2x32xi32> to vector<2xi32>
    %328 = vector.shape_cast %327 : vector<2xi32> to vector<2x1xi32>
    %329 = vector.broadcast %328 : vector<2x1xi32> to vector<2x32xi32>
    %330 = arith.cmpi eq, %9, %329 : vector<2x32xi32>
    %331 = arith.extui %330 : vector<2x32xi1> to vector<2x32xi32>
    %332 = arith.sitofp %331 : vector<2x32xi32> to vector<2x32xf32>
    %333 = vector.broadcast %322 : vector<2x1xf32> to vector<2x32xf32>
    %334 = arith.subf %320, %333 : vector<2x32xf32>
    %335 = vector.shape_cast %334 : vector<2x32xf32> to vector<2x1x32xf32>
    %c0_81 = arith.constant 0 : index
    %c7 = arith.constant 7 : index
    %c0_82 = arith.constant 0 : index
    %336 = vector.load %arg7[%c0_81, %c7, %c0_82] : memref<2x10x32xf32, #tpu.memory_space<vmem>>, vector<2x1x32xf32>
    tpu.vector_store %arg7[%c0_81, %c7, %c0_82], %335 {strides = array<i32>} : memref<2x10x32xf32, #tpu.memory_space<vmem>>, vector<2x1x32xf32>,
    %cst_83 = arith.constant dense<0.000000e+00> : vector<2x384xf32>
    %337 = tpu.matmul %332, %0, %cst_83 {dimension_numbers = #tpu.dot_dimension_numbers<[1], [0], [0], [1], [0, 0, 1, 1], [], []>} : vector<2x32xf32>, vector<32x384xf32>, vector<2x384xf32> -> vector<2x384xf32>
    %338 = vector.extract_strided_slice %337 {offsets = [0, 0], sizes = [2, 256], strides = [1, 1]} : vector<2x384xf32> to vector<2x256xf32>
    %339 = vector.extract_strided_slice %319 {offsets = [0, 128], sizes = [2, 256], strides = [1, 1]} : vector<2x512xf32> to vector<2x256xf32>
    %340 = arith.addf %338, %339 : vector<2x256xf32>
    %341 = arith.negf %340 : vector<2x256xf32>
    %342 = math.exp %341 : vector<2x256xf32>
    %cst_84 = arith.constant 1.000000e+00 : f32
    %343 = vector.broadcast %cst_84 : f32 to vector<2x256xf32>
    %344 = arith.addf %343, %342 : vector<2x256xf32>
    %345 = arith.divf %343, %344 : vector<2x256xf32>
    %346 = vector.extract_strided_slice %345 {offsets = [0, 0], sizes = [2, 32], strides = [1, 1]} : vector<2x256xf32> to vector<2x32xf32>
    %347 = vector.extract_strided_slice %345 {offsets = [0, 128], sizes = [2, 32], strides = [1, 1]} : vector<2x256xf32> to vector<2x32xf32>
    %348 = vector.extract_strided_slice %337 {offsets = [0, 256], sizes = [2, 32], strides = [1, 1]} : vector<2x384xf32> to vector<2x32xf32>
    %349 = vector.extract_strided_slice %319 {offsets = [0, 384], sizes = [2, 32], strides = [1, 1]} : vector<2x512xf32> to vector<2x32xf32>
    %350 = arith.mulf %346, %349 : vector<2x32xf32>
    %351 = arith.addf %348, %350 : vector<2x32xf32>
    %352 = math.tanh %351 : vector<2x32xf32>
    %cst_85 = arith.constant 1.000000e+00 : f32
    %353 = vector.broadcast %cst_85 : f32 to vector<2x32xf32>
    %354 = arith.subf %353, %347 : vector<2x32xf32>
    %355 = arith.mulf %354, %352 : vector<2x32xf32>
    %356 = arith.mulf %347, %317 : vector<2x32xf32>
    %357 = arith.addf %355, %356 : vector<2x32xf32>
    %cst_86 = arith.constant dense<0.000000e+00> : vector<2x512xf32>
    %358 = tpu.matmul %357, %1, %cst_86 {dimension_numbers = #tpu.dot_dimension_numbers<[1], [0], [0], [1], [0, 0, 1, 1], [], []>} : vector<2x32xf32>, vector<32x512xf32>, vector<2x512xf32> -> vector<2x512xf32>
    %359 = arith.addf %358, %5 : vector<2x512xf32>
    %360 = vector.extract_strided_slice %359 {offsets = [0, 0], sizes = [2, 32], strides = [1, 1]} : vector<2x512xf32> to vector<2x32xf32>
    %cst_87 = arith.constant dense<0xFF800000> : vector<2xf32>
    %361 = vector.multi_reduction <maximumf>, %360, %cst_87 [1] : vector<2x32xf32> to vector<2xf32>
    %362 = vector.shape_cast %361 : vector<2xf32> to vector<2x1xf32>
    %363 = vector.broadcast %362 : vector<2x1xf32> to vector<2x32xf32>
    %364 = arith.cmpf oeq, %360, %363 : vector<2x32xf32>
    %c32_i32_88 = arith.constant 32 : i32
    %365 = vector.broadcast %c32_i32_88 : i32 to vector<2x32xi32>
    %366 = arith.select %364, %9, %365 : vector<2x32xi1>, vector<2x32xi32>
    %cst_89 = arith.constant dense<2147483647> : vector<2xi32>
    %367 = vector.multi_reduction <minsi>, %366, %cst_89 [1] : vector<2x32xi32> to vector<2xi32>
    %368 = vector.shape_cast %367 : vector<2xi32> to vector<2x1xi32>
    %369 = vector.broadcast %368 : vector<2x1xi32> to vector<2x32xi32>
    %370 = arith.cmpi eq, %9, %369 : vector<2x32xi32>
    %371 = arith.extui %370 : vector<2x32xi1> to vector<2x32xi32>
    %372 = arith.sitofp %371 : vector<2x32xi32> to vector<2x32xf32>
    %373 = vector.broadcast %362 : vector<2x1xf32> to vector<2x32xf32>
    %374 = arith.subf %360, %373 : vector<2x32xf32>
    %375 = vector.shape_cast %374 : vector<2x32xf32> to vector<2x1x32xf32>
    %c0_90 = arith.constant 0 : index
    %c8 = arith.constant 8 : index
    %c0_91 = arith.constant 0 : index
    %376 = vector.load %arg7[%c0_90, %c8, %c0_91] : memref<2x10x32xf32, #tpu.memory_space<vmem>>, vector<2x1x32xf32>
    tpu.vector_store %arg7[%c0_90, %c8, %c0_91], %375 {strides = array<i32>} : memref<2x10x32xf32, #tpu.memory_space<vmem>>, vector<2x1x32xf32>,
    %cst_92 = arith.constant dense<0.000000e+00> : vector<2x384xf32>
    %377 = tpu.matmul %372, %0, %cst_92 {dimension_numbers = #tpu.dot_dimension_numbers<[1], [0], [0], [1], [0, 0, 1, 1], [], []>} : vector<2x32xf32>, vector<32x384xf32>, vector<2x384xf32> -> vector<2x384xf32>
    %378 = vector.extract_strided_slice %377 {offsets = [0, 0], sizes = [2, 256], strides = [1, 1]} : vector<2x384xf32> to vector<2x256xf32>
    %379 = vector.extract_strided_slice %359 {offsets = [0, 128], sizes = [2, 256], strides = [1, 1]} : vector<2x512xf32> to vector<2x256xf32>
    %380 = arith.addf %378, %379 : vector<2x256xf32>
    %381 = arith.negf %380 : vector<2x256xf32>
    %382 = math.exp %381 : vector<2x256xf32>
    %cst_93 = arith.constant 1.000000e+00 : f32
    %383 = vector.broadcast %cst_93 : f32 to vector<2x256xf32>
    %384 = arith.addf %383, %382 : vector<2x256xf32>
    %385 = arith.divf %383, %384 : vector<2x256xf32>
    %386 = vector.extract_strided_slice %385 {offsets = [0, 0], sizes = [2, 32], strides = [1, 1]} : vector<2x256xf32> to vector<2x32xf32>
    %387 = vector.extract_strided_slice %385 {offsets = [0, 128], sizes = [2, 32], strides = [1, 1]} : vector<2x256xf32> to vector<2x32xf32>
    %388 = vector.extract_strided_slice %377 {offsets = [0, 256], sizes = [2, 32], strides = [1, 1]} : vector<2x384xf32> to vector<2x32xf32>
    %389 = vector.extract_strided_slice %359 {offsets = [0, 384], sizes = [2, 32], strides = [1, 1]} : vector<2x512xf32> to vector<2x32xf32>
    %390 = arith.mulf %386, %389 : vector<2x32xf32>
    %391 = arith.addf %388, %390 : vector<2x32xf32>
    %392 = math.tanh %391 : vector<2x32xf32>
    %cst_94 = arith.constant 1.000000e+00 : f32
    %393 = vector.broadcast %cst_94 : f32 to vector<2x32xf32>
    %394 = arith.subf %393, %387 : vector<2x32xf32>
    %395 = arith.mulf %394, %392 : vector<2x32xf32>
    %396 = arith.mulf %387, %357 : vector<2x32xf32>
    %397 = arith.addf %395, %396 : vector<2x32xf32>
    %cst_95 = arith.constant dense<0.000000e+00> : vector<2x32xf32>
    %398 = tpu.matmul %397, %2, %cst_95 {dimension_numbers = #tpu.dot_dimension_numbers<[1], [0], [0], [1], [0, 0, 1, 1], [], []>} : vector<2x32xf32>, vector<32x32xf32>, vector<2x32xf32> -> vector<2x32xf32>
    %399 = arith.addf %398, %8 : vector<2x32xf32>
    %cst_96 = arith.constant dense<0xFF800000> : vector<2xf32>
    %400 = vector.multi_reduction <maximumf>, %399, %cst_96 [1] : vector<2x32xf32> to vector<2xf32>
    %401 = vector.shape_cast %400 : vector<2xf32> to vector<2x1xf32>
    %402 = vector.broadcast %401 : vector<2x1xf32> to vector<2x32xf32>
    %403 = arith.subf %399, %402 : vector<2x32xf32>
    %404 = vector.shape_cast %403 : vector<2x32xf32> to vector<2x1x32xf32>
    %c0_97 = arith.constant 0 : index
    %c9 = arith.constant 9 : index
    %c0_98 = arith.constant 0 : index
    %405 = vector.load %arg7[%c0_97, %c9, %c0_98] : memref<2x10x32xf32, #tpu.memory_space<vmem>>, vector<2x1x32xf32>
    tpu.vector_store %arg7[%c0_97, %c9, %c0_98], %404 {strides = array<i32>} : memref<2x10x32xf32, #tpu.memory_space<vmem>>, vector<2x1x32xf32>,
    %c0_99 = arith.constant 0 : index
    %c0_100 = arith.constant 0 : index
    %c0_101 = arith.constant 0 : index
    %406 = vector.load %arg7[%c0_99, %c0_100, %c0_101] : memref<2x10x32xf32, #tpu.memory_space<vmem>>, vector<2x10x32xf32>
    %407 = math.exp %406 : vector<2x10x32xf32>
    %cst_102 = arith.constant dense<0.000000e+00> : vector<2x10xf32>
    %408 = vector.multi_reduction <add>, %407, %cst_102 [2] : vector<2x10x32xf32> to vector<2x10xf32>
    %409 = vector.shape_cast %408 : vector<2x10xf32> to vector<2x10x1xf32>
    %410 = math.log %409 : vector<2x10x1xf32>
    %411 = vector.broadcast %410 : vector<2x10x1xf32> to vector<2x10x32xf32>
    %412 = arith.subf %406, %411 : vector<2x10x32xf32>
    %c0_103 = arith.constant 0 : index
    %c0_104 = arith.constant 0 : index
    %c0_105 = arith.constant 0 : index
    %413 = vector.load %arg7[%c0_103, %c0_104, %c0_105] : memref<2x10x32xf32, #tpu.memory_space<vmem>>, vector<2x10x32xf32>
    tpu.vector_store %arg7[%c0_103, %c0_104, %c0_105], %412 {strides = array<i32>} : memref<2x10x32xf32, #tpu.memory_space<vmem>>, vector<2x10x32xf32>,
    %c0_106 = arith.constant 0 : index
    %c0_107 = arith.constant 0 : index
    %414 = vector.load %arg8[%c0_106, %c0_107] : memref<2x32xf32, #tpu.memory_space<vmem>>, vector<2x32xf32>
    tpu.vector_store %arg8[%c0_106, %c0_107], %397 {strides = array<i32>} : memref<2x32xf32, #tpu.memory_space<vmem>>, vector<2x32xf32>,
    return
  }
  func.func @transform_0(%arg0: i32) -> (i32, i32) {
    %c0_i32 = arith.constant 0 : i32
    %c0_i32_0 = arith.constant 0 : i32
    %c0_i32_1 = arith.constant 0 : i32
    return %c0_i32, %c0_i32_0 : i32, i32
  }
  func.func @transform_1(%arg0: i32) -> (i32, i32) {
    %c0_i32 = arith.constant 0 : i32
    %c0_i32_0 = arith.constant 0 : i32
    %c0_i32_1 = arith.constant 0 : i32
    return %c0_i32, %c0_i32_0 : i32, i32
  }
  func.func @transform_2(%arg0: i32) -> (i32, i32) {
    %c0_i32 = arith.constant 0 : i32
    %c0_i32_0 = arith.constant 0 : i32
    %c0_i32_1 = arith.constant 0 : i32
    return %c0_i32, %c0_i32_0 : i32, i32
  }
  func.func @transform_3(%arg0: i32) -> (i32, i32) {
    %c0_i32 = arith.constant 0 : i32
    %c0_i32_0 = arith.constant 0 : i32
    %c0_i32_1 = arith.constant 0 : i32
    return %c0_i32, %c0_i32_0 : i32, i32
  }
  func.func @transform_4(%arg0: i32) -> (i32, i32) {
    %c0_i32 = arith.constant 0 : i32
    %c0_i32_0 = arith.constant 0 : i32
    %c0_i32_1 = arith.constant 0 : i32
    return %c0_i32, %c0_i32_0 : i32, i32
  }
  func.func @transform_5(%arg0: i32) -> (i32, i32) {
    %c0_i32 = arith.constant 0 : i32
    %c0_i32_0 = arith.constant 0 : i32
    return %arg0, %c0_i32 : i32, i32
  }
  func.func @transform_6(%arg0: i32) -> (i32, i32, i32) {
    %c0_i32 = arith.constant 0 : i32
    %c0_i32_0 = arith.constant 0 : i32
    %c0_i32_1 = arith.constant 0 : i32
    return %arg0, %c0_i32, %c0_i32_0 : i32, i32, i32
  }
  func.func @transform_7(%arg0: i32) -> (i32, i32) {
    %c0_i32 = arith.constant 0 : i32
    %c0_i32_0 = arith.constant 0 : i32
    return %arg0, %c0_i32 : i32, i32
  }
}

</mosaic_0001>

<bundles_post_ra>
// kernel: tpu_custom_call.1
= control target key start
LH: loop header
LB: loop body
LE: loop exit
PB: predicated region body
PF: predicated region fallthrough
CT: control target
= control target key end

     0   :  { %13 = vsyncpa [#allocation3], 0  ;;  %s5292_s0 = inlined_call_operand.hbm [shape: f32[32,384], index: 0, kind: input, shape index: {}]   ;;  %s5293_s1 = inlined_call_operand.hbm [shape: f32[32,512], index: 1, kind: input, shape index: {}]   ;;  %s5294_s2 = inlined_call_operand.hbm [shape: f32[1,512], index: 2, kind: input, shape index: {}]   ;;  %s5295_s3 = inlined_call_operand.hbm [shape: f32[32,32], index: 3, kind: input, shape index: {}]   ;;  %s5296_s4 = inlined_call_operand.vmem [shape: f32[1,32], index: 4, kind: input, shape index: {}]   ;;  %s5297_s5 = inlined_call_operand.vmem [shape: f32[2,32], index: 5, kind: input, shape index: {}]   ;;  %s5298_s6 = inlined_call_operand.vmem [shape: f32[2,10,32], index: 6, kind: output, shape index: {0}]   ;;  %s5299_s7 = inlined_call_operand.hbm [shape: f32[2,32], index: 7, kind: output, shape index: {1}]  }
   0x1   :  { %14 = vsyncpa [#allocation6], 0 }
   0x2   :  { %15 = vsyncpa [#allocation9], 0 }
   0x3   :  { %16 = vsyncpa [#allocation4], 0  ;;  %s4387_s24 = smov [#allocation5]  }
   0x4   :  { %s34_s25 = sshll.u32 %s4387_s24, 4  ;;  %s35_s25 = int_to_ptr.vmem [resolvable:$true] %s34_s25 }
   0x5   :  { %s4287_s26 = scalar_lea.vmem %s35_s25, 2048  ;;  %p4292_p1 = scmp.lt.s32.totalorder %s35_s25, %s35_s25 }
   0x6   :  { %p4288_p0 = scmp.ne.s32.totalorder %s35_s25, %s4287_s26  ;;  %p4293_p2 = scmp.lt.s32.totalorder %s4287_s26, %s4287_s26 }
   0x8   :  { %p4294_p3 = por %p4293_p2, %p4292_p1 }
   0xa   :  { %p4295_p4 = pnand %p4294_p3, %p4288_p0 }
   0xc   :  { %4298 = shalt.err (!%p4295_p4)
}
   0xd   :  { %s4388_s27 = smov 512   ;;  %s4389_s28 = smov 32  }
   0xe   :  { %40 = dma.hbm_to_vmem [thread:$0]  %s5293_s1, 2048, %s35_s25, [#allocation6], %s4388_s27, %s4388_s27, %s4389_s28  }
   0xf   :  { %s4390_s8 = smov [#allocation2]  }
  0x10   :  { %s22_s9 = sshll.u32 %s4390_s8, 4  ;;  %s23_s9 = int_to_ptr.vmem [resolvable:$true] %s22_s9 }
  0x11   :  { %s4307_s10 = scalar_lea.vmem %s23_s9, 1536  ;;  %p4312_p6 = scmp.lt.s32.totalorder %s23_s9, %s23_s9 }
  0x12   :  { %p4308_p5 = scmp.ne.s32.totalorder %s23_s9, %s4307_s10  ;;  %p4313_p7 = scmp.lt.s32.totalorder %s4307_s10, %s4307_s10 }
  0x14   :  { %p4314_p8 = por %p4313_p7, %p4312_p6 }
  0x16   :  { %p4315_p9 = pnand %p4314_p8, %p4308_p5 }
  0x18   :  { %4318 = shalt.err (!%p4315_p9)
}
  0x19   :  { %s4391_s11 = smov 384   ;;  %s4392_s12 = smov 24  }
  0x1a   :  { %28 = dma.hbm_to_vmem [thread:$0]  %s5292_s0, 1536, %s23_s9, [#allocation3], %s4391_s11, %s4391_s11, %s4392_s12  }
  0x1b   :  { %s4393_s15 = smov [#allocation7]   ;;  %s4394_s17 = smov [#allocation8]  }
  0x1c   :  { %s47_s16 = sshll.u32 %s4393_s15, 4  ;;  %s56_s1 = sshll.u32 %s4394_s17, 4  ;;  %s48_s16 = int_to_ptr.vmem [resolvable:$true] %s47_s16  ;;  %s57_s1 = int_to_ptr.vmem [resolvable:$true] %s56_s1 }
  0x1d   :  { %s4327_s18 = scalar_lea.vmem %s48_s16, 64  ;;  %p4332_p11 = scmp.lt.s32.totalorder %s48_s16, %s48_s16 }
  0x1e   :  { %p4328_p10 = scmp.ne.s32.totalorder %s48_s16, %s4327_s18  ;;  %p4333_p12 = scmp.lt.s32.totalorder %s4327_s18, %s4327_s18 }
  0x20   :  { %p4334_p13 = por %p4333_p12, %p4332_p11 }
  0x22   :  { %p4335_p0 = pnand %p4334_p13, %p4328_p10 }
  0x24   :  { %4338 = shalt.err (!%p4335_p0)
}
  0x25   :  { %50 = dma.hbm_to_vmem [thread:$0]  %s5294_s2, 64, %s48_s16, [#allocation6]  }
  0x26   :  { %s4347_s21 = scalar_lea.vmem %s57_s1, 512  ;;  %p4352_p2 = scmp.lt.s32.totalorder %s57_s1, %s57_s1 }
  0x27   :  { %p4348_p1 = scmp.ne.s32.totalorder %s57_s1, %s4347_s21  ;;  %p4353_p3 = scmp.lt.s32.totalorder %s4347_s21, %s4347_s21 }
  0x29   :  { %p4354_p4 = por %p4353_p3, %p4352_p2 }
  0x2b   :  { %p4355_p5 = pnand %p4354_p4, %p4348_p1 }
  0x2d   :  { %4358 = shalt.err (!%p4355_p5)
}
  0x2e   :  { %s4395_s0 = smov 128   ;;  %s4396_s22 = smov 8  }
  0x2f   :  { %62 = dma.hbm_to_vmem [thread:$0]  %s5295_s3, 512, %s57_s1, [#allocation9], %s4395_s0, %s4395_s0, %s4396_s22  }
  0x30   :  { %4379 = dma.done.wait [#allocation3], 1536  }
  0x31   :  { %4380 = vsyncadd [#allocation3], 4294965760 }
  0x32   :  { %4381 = dma.done.wait [#allocation6], 2112  }
  0x33   :  { %4382 = vsyncadd [#allocation6], 4294965184 }
  0x34   :  { %4383 = dma.done.wait [#allocation9], 512  }
  0x35   :  { %4384 = vsyncadd [#allocation9], 4294966784  ;;  %v4397_v0 = vmov 0.0   ;;  %v4455_v1 = vld [vmem:[#allocation5 + $0x68] sm:$0xff]  ;;  %v4457_v2 = vld [vmem:[#allocation5 + $0x60] sm:$0xff]  ;;  %v113_v9 = vlaneseq  ;;  %vm146_vm0 = vcmask 261120  }
  0x36   :  { %214 = vmatprep.mubr.f32.mxu0 %v4397_v0  ;;  %284 = vmatprep.mubr.f32.mxu1 %v4397_v0  ;;  %v4459_v3 = vld [vmem:[#allocation5 + $0x48] sm:$0xff]  ;;  %v4462_v4 = vld [vmem:[#allocation5 + $0x40] sm:$0xff]  ;;  %v4470_v7 = vld [vmem:[#allocation5 + $0x78] sm:$0xff]  ;;  %vm4398_vm2 = vmmov 0   ;;  %vm601_vm3 = vcmask 254976   ;;  %vm651_vm5 = vcmask 253952  }
  0x37   :  { %174 = vmatprep.subr.mxu0 %v4455_v1  ;;  %v4465_v5 = vld [vmem:[#allocation5 + $0x28] sm:$0xff]  ;;  %v4468_v6 = vld [vmem:[#allocation5 + $0x20] sm:$0xff]  ;;  %v4472_v8 = vld [vmem:[#allocation5 + $0x70] sm:$0xff]  ;;  %244 = vmatprep.subr.mxu1 %v4470_v7  ;;  %v4504_v19 = vand.u32 127, %v113_v9  ;;  %v4583_v33 = vshrl.u32 %v113_v9, 7  ;;  %s4400_s24 = smov [#allocation10]  }
  0x38   :  { %175 = vmatpush1.msra.mxu0 %v4457_v2  ;;  %v4475_v10 = vld [vmem:[#allocation5 + $0x8] sm:$0xff]  ;;  %v4478_v11 = vld [vmem:[#allocation5 + $0x58] sm:$0xff]  ;;  %v4481_v12 = vld [vmem:[#allocation5] sm:$0xff]  ;;  %245 = vmatpush1.msra.mxu1 %v4472_v8  ;;  %s3860_s2 = sshll.u32 %s4400_s24, 4  ;;  %s3861_s2 = int_to_ptr.vmem [resolvable:$true] %s3860_s2 }
  0x39   :  { %176 = vmatprep.subr.mxu0 %v4459_v3  ;;  %v4484_v13 = vld [vmem:[#allocation5 + $0x50] sm:$0xff]  ;;  %v4486_v14 = vld [vmem:[#allocation5 + $0x38] sm:$0xff]  ;;  %v4492_v15 = vld [vmem:[%s5297_s5] sm:$0x3]  ;;  %246 = vmatprep.subr.mxu1 %v4478_v11  ;;  %vm142_vm1 = vcmp.eq.s32.totalorder %v4504_v19, 0  ;;  %v119_v34 = vsub.s32 1, %v4583_v33  ;;  %p4364_p7 = scmp.lt.s32.totalorder %s3861_s2, %s3861_s2 }
  0x3a   :  { %177 = vmatpush1.msra.mxu0 %v4462_v4  ;;  %v4494_v16 = vld [vmem:[#allocation2 + $0x50] sm:$0xff]  ;;  %v4498_v17 = vld [vmem:[#allocation2 + $0x48] sm:$0xff]  ;;  %247 = vmatpush1.msra.mxu1 %v4484_v13  ;;  %v4507_v20 = vld [vmem:[#allocation2 + $0x38] sm:$0xff]  ;;  %v3874_v29 = vsel %vm142_vm1, 1.0, %v4397_v0  ;;  %v123_v38 = vsub.s32 2, %v4583_v33  ;;  %v127_v55 = vsub.s32 3, %v4583_v33 }
  0x3b   :  { %178 = vmatprep.subr.mxu0 %v4465_v5  ;;  %v4501_v18 = vld [vmem:[#allocation5 + $0x30] sm:$0xff]  ;;  %248 = vmatprep.subr.mxu1 %v4486_v14  ;;  %v4510_v21 = vld [vmem:[#allocation5 + $0x18] sm:$0xff]  ;;  %v4520_v24 = vld [vmem:[#allocation2 + $0x20] sm:$0xff]  ;;  %s4359_s3 = scalar_lea.vmem %s3861_s2, 32 }
  0x3c   :  { %179 = vmatpush1.msra.mxu0 %v4468_v6  ;;  %v4515_v22 = vld [vmem:[#allocation2 + $0x30] sm:$0xff]  ;;  %249 = vmatpush1.msra.mxu1 %v4501_v18  ;;  %v4524_v25 = vld [vmem:[#allocation2 + $0x18] sm:$0xff]  ;;  %v4529_v26 = vld [vmem:[#allocation2 + $0x8] sm:$0xff]  ;;  %p4360_p6 = scmp.ne.s32.totalorder %s3861_s2, %s4359_s3  ;;  %p4365_p8 = scmp.lt.s32.totalorder %s4359_s3, %s4359_s3 }
  0x3d   :  { %180 = vmatprep.subr.mxu0 %v4475_v10  ;;  %v4517_v23 = vld [vmem:[#allocation5 + $0x10] sm:$0xff]  ;;  %250 = vmatprep.subr.mxu1 %v4510_v21  ;;  %v4533_v27 = vld [vmem:[#allocation2] sm:$0xff]  ;;  %v4536_v28 = vld [vmem:[#allocation2 + $0x58] sm:$0xff] }
  0x3e   :  { %181 = vmatpush1.msra.mxu0 %v4481_v12  ;;  %251 = vmatpush1.msra.mxu1 %v4517_v23  ;;  %v4544_v30 = vld [vmem:[#allocation2 + $0x40] sm:$0xff]  ;;  %v4550_v31 = vld [vmem:[#allocation2 + $0x28] sm:$0xff]  ;;  %v4556_v32 = vld [vmem:[#allocation2 + $0x10] sm:$0xff]  ;;  %p4366_p9 = por %p4365_p8, %p4364_p7 }
  0x3f   :  { %3875 = vmatmul.mubr.msk.f32.vlgmr.msra.gmra.mxu0 %vm146_vm0, %v4492_v15  ;;  %318 = vmatprep.subr.mxu0 %v4494_v16  ;;  %v111_v36 = vld [vmem:[#allocation7] sm:$0xf] }
  0x40   :  { %319 = vmatpush1.msra.mxu0 %v4498_v17  ;;  %358 = vmatprep.mubr.f32.mxu0 %v4397_v0  ;;  %v4586_v37 = vrot.slane %v111_v36, %v119_v34  ;;  %v4590_v41 = vrot.slane %v111_v36, %v123_v38  ;;  %v4594_v57 = vrot.slane %v111_v36, %v127_v55  ;;  %p4367_p10 = pnand %p4366_p9, %p4360_p6 }
  0x41   :  { %320 = vmatprep.subr.mxu0 %v4507_v20  ;;  %3876 = vmatmul.mubr.msk.f32.vlgmr.msra.gmra.mxu1 %vm146_vm0, %v4492_v15 }
  0x42   :  { %321 = vmatpush1.msra.mxu0 %v4515_v22  ;;  %4000 = vmatprep.subr.mxu1 %v4397_v0 }
  0x43   :  { %322 = vmatprep.subr.mxu0 %v4520_v24  ;;  %4001 = vmatpush3.msra.mxu1 %v4536_v28 }
  0x44   :  { %323 = vmatpush1.msra.mxu0 %v4524_v25  ;;  %4002 = vmatprep.subr.mxu1 %v4397_v0 }
  0x45   :  { %324 = vmatprep.subr.mxu0 %v4529_v26  ;;  %4003 = vmatpush3.msra.mxu1 %v4544_v30 }
  0x46   :  { %325 = vmatpush1.msra.mxu0 %v4533_v27  ;;  %4008 = vmatprep.mubr.msk.f32.mxu1 %vm4398_vm2, %v4397_v0 }
  0x47   :  { %3877 = vmatmul.mubr.msk.f32.vlgmr.msra.gmra.mxu0 %vm146_vm0, %v3874_v29  ;;  %4004 = vmatprep.subr.mxu1 %v4397_v0 }
  0x48   :  { %483 = vmatprep.subr.mxu0 %v4455_v1  ;;  %4005 = vmatpush3.msra.mxu1 %v4550_v31 }
  0x49   :  { %484 = vmatpush1.msra.mxu0 %v4457_v2  ;;  %4006 = vmatprep.subr.mxu1 %v4397_v0 }
  0x4a   :  { %485 = vmatprep.subr.mxu0 %v4459_v3  ;;  %4007 = vmatpush3.msra.mxu1 %v4556_v32 }
  0x4b   :  { %486 = vmatpush1.msra.mxu0 %v4462_v4  ;;  %4009 = vmatmul.mubr.msk.f32.vlgmr.msra.gmra.mxu1 %vm146_vm0, %v3874_v29 }
  0x4c   :  { %554 = vmatprep.subr.mxu1 %v4470_v7  ;;  %487 = vmatprep.subr.mxu0 %v4465_v5 }
  0x4d   :  { %555 = vmatpush1.msra.mxu1 %v4472_v8  ;;  %488 = vmatpush1.msra.mxu0 %v4468_v6 }
  0x4e   :  { %556 = vmatprep.subr.mxu1 %v4478_v11  ;;  %489 = vmatprep.subr.mxu0 %v4475_v10 }
  0x4f   :  { %557 = vmatpush1.msra.mxu1 %v4484_v13  ;;  %490 = vmatpush1.msra.mxu0 %v4481_v12 }
  0x50   :  { %558 = vmatprep.subr.mxu1 %v4486_v14  ;;  %523 = vmatprep.mubr.f32.mxu0 %v4397_v0 }
  0x51   :  { %559 = vmatpush1.msra.mxu1 %v4501_v18  ;;  %594 = vmatprep.mubr.f32.mxu1 %v4397_v0 }
  0x52   :  { %560 = vmatprep.subr.mxu1 %v4510_v21  ;;  %681 = vmatprep.subr.mxu0 %v4494_v16 }
  0x53   :  { %561 = vmatpush1.msra.mxu1 %v4517_v23 }
  0x54   :  { %4011 = vmatprep.subr.mxu1 %v4397_v0 }
  0xff   :  { %v216_v35 = vpop.f32.mrf.mxu0 }
 0x101   :  { %v217_v39 = vpop.f32.mrf.mxu0  ;;  %v286_v42 = vpop.f32.mrf.mxu1 }
 0x102   :  { %v218_v40 = vadd.f32 %v217_v39, %v4586_v37  ;;  %v287_v45 = vadd.f32 %v286_v42, %v4590_v41 }
 0x103   :  { %v288_v48 = vpop.f32.mrf.mxu1 }
 0x104   :  { %v289_v59 = vadd.f32 %v288_v48, %v4594_v57 }
 0x107   :  { %v360_v43 = vpop.f32.mrf.mxu0 }
 0x108   :  { %v435_v44 = vadd.f32 %v360_v43, %v218_v40 }
 0x109   :  { %v362_v47 = vpop.f32.mrf.mxu0 }
 0x10a   :  { %v3879_v46 = vmul.f32 -1.442695, %v435_v44  ;;  %v436_v50 = vadd.f32 %v362_v47, %v287_v45  ;;  %v4399_v44 = vmov 1966171168  }
 0x10b   :  { %v431_v49 = vpop.f32.mrf.mxu1  ;;  %v628_v45 = vunpack.c.l.s4 %v4399_v44 }
 0x10c   :  { %4135 = vpow2.f32 %v3879_v46  ;;  %v3880_v52 = vmul.f32 -1.442695, %v436_v50 }
 0x10d   :  { %v4010_v51 = vpop.f32.mrf.mxu1  ;;  %v629_v46 = vunpack.c.0.s8 %v628_v45 }
 0x10e   :  { %4137 = vpow2.f32 %v3880_v52 }
 0x10f   :  { %v4629_v47 = vsub.s32 %v629_v46, %v4583_v33 }
 0x119   :  { %v4136_v53 = vpop.eup %4135 }
 0x11a   :  { %v443_v54 = vadd.f32 1.0, %v4136_v53 }
 0x11b   :  { %v4138_v56 = vpop.eup %4137 }
 0x11c   :  { %4139 = vrcp.f32 %v443_v54  ;;  %v444_v58 = vadd.f32 1.0, %v4138_v56 }
 0x11e   :  { %4141 = vrcp.f32 %v444_v58 }
 0x129   :  { %v4140_v60 = vpop.eup %4139 }
 0x12a   :  { %v449_v61 = vmul.f32 %v4140_v60, %v289_v59 }
 0x12b   :  { %v4142_v63 = vpop.eup %4141 }
 0x12c   :  { %v450_v62 = vadd.f32 %v449_v61, %v431_v49  ;;  %v452_v9 = vsub.f32 1.0, %v4142_v63  ;;  %v454_v35 = vmul.f32 %v4142_v63, %v4492_v15  ;;  %v115_v15 = vsub.s32 0, %v4583_v33 }
 0x12e   :  { %4143 = vtanh.f32 %v450_v62  ;;  %v4624_v39 = vrot.slane %v111_v36, %v115_v15 }
 0x13b   :  { %v4144_v29 = vpop.eup %4143 }
 0x13c   :  { %v453_v34 = vmul.f32 %v4144_v29, %v452_v9 }
 0x13e   :  { %v4598_v38 = vadd.f32 %v454_v35, %v453_v34 }
 0x140   :  { %3881 = vmatmul.mubr.msk.f32.vlgmr.msra.gmra.mxu0 %vm146_vm0, %v4598_v38  ;;  %3882 = vmatmul.mubr.msk.f32.vlgmr.msra.gmra.mxu1 %vm146_vm0, %v4598_v38 }
 0x141   :  { %682 = vmatpush1.msra.mxu0 %v4498_v17  ;;  %4012 = vmatpush3.msra.mxu1 %v4536_v28 }
 0x142   :  { %683 = vmatprep.subr.mxu0 %v4507_v20  ;;  %4013 = vmatprep.subr.mxu1 %v4397_v0 }
 0x143   :  { %684 = vmatpush1.msra.mxu0 %v4515_v22  ;;  %4014 = vmatpush3.msra.mxu1 %v4544_v30 }
 0x144   :  { %685 = vmatprep.subr.mxu0 %v4520_v24  ;;  %4015 = vmatprep.subr.mxu1 %v4397_v0 }
 0x145   :  { %686 = vmatpush1.msra.mxu0 %v4524_v25  ;;  %4016 = vmatpush3.msra.mxu1 %v4550_v31 }
 0x146   :  { %687 = vmatprep.subr.mxu0 %v4529_v26  ;;  %4017 = vmatprep.subr.mxu1 %v4397_v0 }
 0x147   :  { %688 = vmatpush1.msra.mxu0 %v4533_v27  ;;  %721 = vmatprep.mubr.f32.mxu0 %v4397_v0 }
 0x148   :  { %4018 = vmatpush3.msra.mxu1 %v4556_v32  ;;  %4019 = vmatprep.mubr.msk.f32.mxu1 %vm4398_vm2, %v4397_v0 }
 0x149   :  { %846 = vmatprep.subr.mxu0 %v4455_v1  ;;  %917 = vmatprep.subr.mxu1 %v4470_v7 }
 0x200   :  { %v525_v40 = vpop.f32.mrf.mxu0  ;;  %v596_v35 = vpop.f32.mrf.mxu1 }
 0x201   :  { %v526_v42 = vadd.f32 %v525_v40, %v4624_v39 }
 0x202   :  { %v527_v15 = vpop.f32.mrf.mxu0  ;;  %v598_v40 = vpop.f32.mrf.mxu1 }
 0x203   :  { %v602_v43 = vsel %vm601_vm3, %v526_v42, -inf }
 0x204   :  { %603 = vmax.xlane.f32.xlu0 %v602_v43 }
 0x28d   :  { %v604_v48 = vpop.xlane.xlu0 %603 }
 0x28e   :  { %vm605_vm4 = vcmp.eq.f32.partialorder %v526_v42, %v604_v48  ;;  %v625_v49 = vsub.f32 %v526_v42, %v604_v48  ;;  %v528_v42 = vadd.f32 %v527_v15, %v4586_v37 }
 0x28f   :  { %v606_v50 = vsel %vm605_vm4, %v4504_v19, 32 }
 0x290   :  { %v633_v36 = vrot.slane %v625_v49, %v4629_v47  ;;  %v607_v51 = vsel %vm601_vm3, %v606_v50, 2147483647  ;;  %v597_v50 = vadd.f32 %v596_v35, %v4590_v41 }
 0x291   :  { %v609_v52 = vshra.s32 %v607_v51, 16  ;;  %v608_v33 = vand.u32 65535, %v607_v51 }
 0x292   :  { %v634_v53 = vcombine.high %v633_v36, %v633_v36  ;;  %v641_v54 = vrot.slane %v633_v36, %v4629_v47 }
 0x293   :  { %v611_v55 = vcvt.s32.f32 %v609_v52  ;;  %v610_v59 = vcvt.s32.f32 %v608_v33 }
 0x294   :  { %v648_v56 = vrot.slane %v634_v53, %v4629_v47  ;;  %652 = vst.msk [vmem:[%s5298_s6] sm:$0x1] %vm651_vm5, %v641_v54 }
 0x295   :  { %612 = vmin.xlane.f32.xlu0 %v611_v55 }
 0x296   :  { %653 = vst.msk [vmem:[%s5298_s6 + $0x10] sm:$0x1] %vm651_vm5, %v648_v56  ;;  %v599_v56 = vadd.f32 %v598_v40, %v4594_v57 }
 0x31e   :  { %v613_v58 = vpop.xlane.xlu0 %612 }
 0x31f   :  { %vm614_vm6 = vcmp.eq.f32.partialorder %v611_v55, %v613_v58  ;;  %v619_v61 = vcvt.f32.s32 %v613_v58 }
 0x320   :  { %v615_v60 = vsel %vm614_vm6, %v610_v59, inf }
 0x321   :  { %616 = vmin.xlane.f32.xlu1 %v615_v60  ;;  %v620_v63 = vshll.u32 %v619_v61, 16 }
 0x3aa   :  { %v617_v62 = vpop.xlane.xlu1 %616 }
 0x3ab   :  { %v618_v9 = vcvt.f32.s32 %v617_v62 }
 0x3ad   :  { %v621_v29 = vadd.s32 %v620_v63, %v618_v9 }
 0x3af   :  { %vm622_vm7 = vcmp.eq.s32.totalorder %v4504_v19, %v621_v29 }
 0x3b0   :  { %v3883_v34 = vsel %vm622_vm7, 1.0, %v4397_v0 }
 0x3b1   :  { %3884 = vmatmul.mubr.msk.f32.vlgmr.msra.gmra.mxu0 %vm146_vm0, %v3883_v34  ;;  %4020 = vmatmul.mubr.msk.f32.vlgmr.msra.gmra.mxu1 %vm146_vm0, %v3883_v34 }
 0x3b2   :  { %847 = vmatpush1.msra.mxu0 %v4457_v2  ;;  %918 = vmatpush1.msra.mxu1 %v4472_v8 }
 0x3b3   :  { %848 = vmatprep.subr.mxu0 %v4459_v3  ;;  %919 = vmatprep.subr.mxu1 %v4478_v11 }
 0x3b4   :  { %849 = vmatpush1.msra.mxu0 %v4462_v4  ;;  %920 = vmatpush1.msra.mxu1 %v4484_v13 }
 0x3b5   :  { %850 = vmatprep.subr.mxu0 %v4465_v5  ;;  %921 = vmatprep.subr.mxu1 %v4486_v14 }
 0x3b6   :  { %851 = vmatpush1.msra.mxu0 %v4468_v6  ;;  %922 = vmatpush1.msra.mxu1 %v4501_v18 }
 0x3b7   :  { %852 = vmatprep.subr.mxu0 %v4475_v10  ;;  %923 = vmatprep.subr.mxu1 %v4510_v21 }
 0x3b8   :  { %853 = vmatpush1.msra.mxu0 %v4481_v12  ;;  %886 = vmatprep.mubr.f32.mxu0 %v4397_v0 }
 0x3b9   :  { %924 = vmatpush1.msra.mxu1 %v4517_v23  ;;  %957 = vmatprep.mubr.f32.mxu1 %v4397_v0 }
 0x3ba   :  { %1042 = vmatprep.subr.mxu0 %v4494_v16  ;;  %4022 = vmatprep.subr.mxu1 %v4397_v0 }
 0x471   :  { %v723_v43 = vpop.f32.mrf.mxu0  ;;  %v794_v44 = vpop.f32.mrf.mxu1 }
 0x472   :  { %v798_v45 = vadd.f32 %v723_v43, %v528_v42 }
 0x473   :  { %v4021_v46 = vpop.f32.mrf.mxu1  ;;  %v725_v49 = vpop.f32.mrf.mxu0 }
 0x474   :  { %v3886_v48 = vmul.f32 -1.442695, %v798_v45  ;;  %v799_v36 = vadd.f32 %v725_v49, %v597_v50 }
 0x476   :  { %4145 = vpow2.f32 %v3886_v48  ;;  %v3887_v51 = vmul.f32 -1.442695, %v799_v36 }
 0x478   :  { %4147 = vpow2.f32 %v3887_v51 }
 0x483   :  { %v4146_v52 = vpop.eup %4145 }
 0x484   :  { %v806_v53 = vadd.f32 1.0, %v4146_v52 }
 0x485   :  { %v4148_v54 = vpop.eup %4147 }
 0x486   :  { %4149 = vrcp.f32 %v806_v53  ;;  %v807_v55 = vadd.f32 1.0, %v4148_v54 }
 0x488   :  { %4151 = vrcp.f32 %v807_v55 }
 0x493   :  { %v4150_v33 = vpop.eup %4149 }
 0x494   :  { %v812_v58 = vmul.f32 %v4150_v33, %v599_v56 }
 0x495   :  { %v4152_v60 = vpop.eup %4151 }
 0x496   :  { %v813_v59 = vadd.f32 %v812_v58, %v794_v44  ;;  %v815_v61 = vsub.f32 1.0, %v4152_v60  ;;  %v817_v9 = vmul.f32 %v4152_v60, %v4598_v38 }
 0x498   :  { %4153 = vtanh.f32 %v813_v59 }
 0x4a5   :  { %v4154_v62 = vpop.eup %4153 }
 0x4a6   :  { %v816_v63 = vmul.f32 %v4154_v62, %v815_v61 }
 0x4a8   :  { %v4670_v29 = vadd.f32 %v817_v9, %v816_v63 }
 0x4aa   :  { %3888 = vmatmul.mubr.msk.f32.vlgmr.msra.gmra.mxu0 %vm146_vm0, %v4670_v29  ;;  %3889 = vmatmul.mubr.msk.f32.vlgmr.msra.gmra.mxu1 %vm146_vm0, %v4670_v29 }
 0x4ab   :  { %1043 = vmatpush1.msra.mxu0 %v4498_v17  ;;  %4023 = vmatpush3.msra.mxu1 %v4536_v28 }
 0x4ac   :  { %1044 = vmatprep.subr.mxu0 %v4507_v20  ;;  %4024 = vmatprep.subr.mxu1 %v4397_v0 }
 0x4ad   :  { %1045 = vmatpush1.msra.mxu0 %v4515_v22  ;;  %4025 = vmatpush3.msra.mxu1 %v4544_v30 }
 0x4ae   :  { %1046 = vmatprep.subr.mxu0 %v4520_v24  ;;  %4026 = vmatprep.subr.mxu1 %v4397_v0 }
 0x4af   :  { %1047 = vmatpush1.msra.mxu0 %v4524_v25  ;;  %4027 = vmatpush3.msra.mxu1 %v4550_v31 }
 0x4b0   :  { %1048 = vmatprep.subr.mxu0 %v4529_v26  ;;  %4028 = vmatprep.subr.mxu1 %v4397_v0 }
 0x4b1   :  { %1049 = vmatpush1.msra.mxu0 %v4533_v27  ;;  %1082 = vmatprep.mubr.f32.mxu0 %v4397_v0 }
 0x4b2   :  { %4029 = vmatpush3.msra.mxu1 %v4556_v32  ;;  %4030 = vmatprep.mubr.msk.f32.mxu1 %vm4398_vm2, %v4397_v0 }
 0x4b3   :  { %1207 = vmatprep.subr.mxu0 %v4455_v1  ;;  %1278 = vmatprep.subr.mxu1 %v4470_v7 }
 0x56a   :  { %v888_v38 = vpop.f32.mrf.mxu0  ;;  %v959_v60 = vpop.f32.mrf.mxu1 }
 0x56b   :  { %v889_v34 = vadd.f32 %v888_v38, %v4624_v39 }
 0x56c   :  { %v890_v61 = vpop.f32.mrf.mxu0  ;;  %v961_v62 = vpop.f32.mrf.mxu1 }
 0x56d   :  { %v964_v35 = vsel %vm601_vm3, %v889_v34, -inf  ;;  %v891_v63 = vadd.f32 %v890_v61, %v4586_v37 }
 0x56e   :  { %965 = vmax.xlane.f32.xlu1 %v964_v35 }
 0x5f7   :  { %v966_v15 = vpop.xlane.xlu1 %965 }
 0x5f8   :  { %vm967_vm8 = vcmp.eq.f32.partialorder %v889_v34, %v966_v15  ;;  %v987_v40 = vsub.f32 %v889_v34, %v966_v15 }
 0x5f9   :  { %v968_v42 = vsel %vm967_vm8, %v4504_v19, 32 }
 0x5fa   :  { %v995_v43 = vrot.slane %v987_v40, %v4629_v47  ;;  %v969_v44 = vsel %vm601_vm3, %v968_v42, 2147483647  ;;  %v960_v42 = vadd.f32 %v959_v60, %v4590_v41 }
 0x5fb   :  { %v971_v45 = vshra.s32 %v969_v44, 16  ;;  %v970_v36 = vand.u32 65535, %v969_v44 }
 0x5fc   :  { %v996_v46 = vcombine.high %v995_v43, %v995_v43  ;;  %v1003_v48 = vrot.slane %v995_v43, %v4629_v47 }
 0x5fd   :  { %v973_v49 = vcvt.s32.f32 %v971_v45  ;;  %v972_v52 = vcvt.s32.f32 %v970_v36 }
 0x5fe   :  { %v1010_v50 = vrot.slane %v996_v46, %v4629_v47  ;;  %1013 = vst.msk [vmem:[%s5298_s6 + $0x1] sm:$0x1] %vm651_vm5, %v1003_v48 }
 0x5ff   :  { %974 = vmin.xlane.f32.xlu0 %v973_v49 }
 0x600   :  { %1014 = vst.msk [vmem:[%s5298_s6 + $0x11] sm:$0x1] %vm651_vm5, %v1010_v50  ;;  %v962_v50 = vadd.f32 %v961_v62, %v4594_v57 }
 0x688   :  { %v975_v51 = vpop.xlane.xlu0 %974 }
 0x689   :  { %vm976_vm9 = vcmp.eq.f32.partialorder %v973_v49, %v975_v51  ;;  %v981_v54 = vcvt.f32.s32 %v975_v51 }
 0x68a   :  { %v977_v53 = vsel %vm976_vm9, %v972_v52, inf }
 0x68b   :  { %978 = vmin.xlane.f32.xlu1 %v977_v53  ;;  %v982_v56 = vshll.u32 %v981_v54, 16 }
 0x714   :  { %v979_v55 = vpop.xlane.xlu1 %978 }
 0x715   :  { %v980_v33 = vcvt.f32.s32 %v979_v55 }
 0x717   :  { %v983_v58 = vadd.s32 %v982_v56, %v980_v33 }
 0x719   :  { %vm984_vm10 = vcmp.eq.s32.totalorder %v4504_v19, %v983_v58 }
 0x71a   :  { %v3890_v59 = vsel %vm984_vm10, 1.0, %v4397_v0 }
 0x71b   :  { %3891 = vmatmul.mubr.msk.f32.vlgmr.msra.gmra.mxu0 %vm146_vm0, %v3890_v59  ;;  %4031 = vmatmul.mubr.msk.f32.vlgmr.msra.gmra.mxu1 %vm146_vm0, %v3890_v59 }
 0x71c   :  { %1208 = vmatpush1.msra.mxu0 %v4457_v2  ;;  %1279 = vmatpush1.msra.mxu1 %v4472_v8 }
 0x71d   :  { %1209 = vmatprep.subr.mxu0 %v4459_v3  ;;  %1280 = vmatprep.subr.mxu1 %v4478_v11 }
 0x71e   :  { %1210 = vmatpush1.msra.mxu0 %v4462_v4  ;;  %1281 = vmatpush1.msra.mxu1 %v4484_v13 }
 0x71f   :  { %1211 = vmatprep.subr.mxu0 %v4465_v5  ;;  %1282 = vmatprep.subr.mxu1 %v4486_v14 }
 0x720   :  { %1212 = vmatpush1.msra.mxu0 %v4468_v6  ;;  %1283 = vmatpush1.msra.mxu1 %v4501_v18 }
 0x721   :  { %1213 = vmatprep.subr.mxu0 %v4475_v10  ;;  %1284 = vmatprep.subr.mxu1 %v4510_v21 }
 0x722   :  { %1214 = vmatpush1.msra.mxu0 %v4481_v12  ;;  %1247 = vmatprep.mubr.f32.mxu0 %v4397_v0 }
 0x723   :  { %1285 = vmatpush1.msra.mxu1 %v4517_v23  ;;  %1318 = vmatprep.mubr.f32.mxu1 %v4397_v0 }
 0x724   :  { %1403 = vmatprep.subr.mxu0 %v4494_v16  ;;  %4033 = vmatprep.subr.mxu1 %v4397_v0 }
 0x7db   :  { %v1084_v9 = vpop.f32.mrf.mxu0  ;;  %v1155_v38 = vpop.f32.mrf.mxu1 }
 0x7dc   :  { %v1159_v34 = vadd.f32 %v1084_v9, %v891_v63 }
 0x7dd   :  { %v4032_v35 = vpop.f32.mrf.mxu1  ;;  %v1086_v40 = vpop.f32.mrf.mxu0 }
 0x7de   :  { %v3893_v15 = vmul.f32 -1.442695, %v1159_v34  ;;  %v1160_v43 = vadd.f32 %v1086_v40, %v960_v42 }
 0x7e0   :  { %4155 = vpow2.f32 %v3893_v15  ;;  %v3894_v44 = vmul.f32 -1.442695, %v1160_v43 }
 0x7e2   :  { %4157 = vpow2.f32 %v3894_v44 }
 0x7ed   :  { %v4156_v45 = vpop.eup %4155 }
 0x7ee   :  { %v1167_v46 = vadd.f32 1.0, %v4156_v45 }
 0x7ef   :  { %v4158_v48 = vpop.eup %4157 }
 0x7f0   :  { %4159 = vrcp.f32 %v1167_v46  ;;  %v1168_v49 = vadd.f32 1.0, %v4158_v48 }
 0x7f2   :  { %4161 = vrcp.f32 %v1168_v49 }
 0x7fd   :  { %v4160_v36 = vpop.eup %4159 }
 0x7fe   :  { %v1173_v51 = vmul.f32 %v4160_v36, %v962_v50 }
 0x7ff   :  { %v4162_v53 = vpop.eup %4161 }
 0x800   :  { %v1174_v52 = vadd.f32 %v1173_v51, %v1155_v38  ;;  %v1176_v54 = vsub.f32 1.0, %v4162_v53  ;;  %v1178_v33 = vmul.f32 %v4162_v53, %v4670_v29 }
 0x802   :  { %4163 = vtanh.f32 %v1174_v52 }
 0x80f   :  { %v4164_v55 = vpop.eup %4163 }
 0x810   :  { %v1177_v56 = vmul.f32 %v4164_v55, %v1176_v54 }
 0x812   :  { %v4736_v58 = vadd.f32 %v1178_v33, %v1177_v56 }
 0x814   :  { %3895 = vmatmul.mubr.msk.f32.vlgmr.msra.gmra.mxu0 %vm146_vm0, %v4736_v58  ;;  %3896 = vmatmul.mubr.msk.f32.vlgmr.msra.gmra.mxu1 %vm146_vm0, %v4736_v58 }
 0x815   :  { %1404 = vmatpush1.msra.mxu0 %v4498_v17  ;;  %4034 = vmatpush3.msra.mxu1 %v4536_v28 }
 0x816   :  { %1405 = vmatprep.subr.mxu0 %v4507_v20  ;;  %4035 = vmatprep.subr.mxu1 %v4397_v0 }
 0x817   :  { %1406 = vmatpush1.msra.mxu0 %v4515_v22  ;;  %4036 = vmatpush3.msra.mxu1 %v4544_v30 }
 0x818   :  { %1407 = vmatprep.subr.mxu0 %v4520_v24  ;;  %4037 = vmatprep.subr.mxu1 %v4397_v0 }
 0x819   :  { %1408 = vmatpush1.msra.mxu0 %v4524_v25  ;;  %4038 = vmatpush3.msra.mxu1 %v4550_v31 }
 0x81a   :  { %1409 = vmatprep.subr.mxu0 %v4529_v26  ;;  %4039 = vmatprep.subr.mxu1 %v4397_v0 }
 0x81b   :  { %1410 = vmatpush1.msra.mxu0 %v4533_v27  ;;  %1443 = vmatprep.mubr.f32.mxu0 %v4397_v0 }
 0x81c   :  { %4040 = vmatpush3.msra.mxu1 %v4556_v32  ;;  %4041 = vmatprep.mubr.msk.f32.mxu1 %vm4398_vm2, %v4397_v0 }
 0x81d   :  { %1568 = vmatprep.subr.mxu0 %v4455_v1  ;;  %1639 = vmatprep.subr.mxu1 %v4470_v7 }
 0x8d4   :  { %v1249_v29 = vpop.f32.mrf.mxu0  ;;  %v1320_v53 = vpop.f32.mrf.mxu1 }
 0x8d5   :  { %v1250_v59 = vadd.f32 %v1249_v29, %v4624_v39 }
 0x8d6   :  { %v1251_v54 = vpop.f32.mrf.mxu0  ;;  %v1322_v55 = vpop.f32.mrf.mxu1 }
 0x8d7   :  { %v1325_v60 = vsel %vm601_vm3, %v1250_v59, -inf  ;;  %v1252_v56 = vadd.f32 %v1251_v54, %v4586_v37 }
 0x8d8   :  { %1326 = vmax.xlane.f32.xlu0 %v1325_v60 }
 0x961   :  { %v1327_v61 = vpop.xlane.xlu0 %1326 }
 0x962   :  { %vm1328_vm11 = vcmp.eq.f32.partialorder %v1250_v59, %v1327_v61  ;;  %v1348_v62 = vsub.f32 %v1250_v59, %v1327_v61 }
 0x963   :  { %v1329_v63 = vsel %vm1328_vm11, %v4504_v19, 32 }
 0x964   :  { %v1356_v9 = vrot.slane %v1348_v62, %v4629_v47  ;;  %v1330_v38 = vsel %vm601_vm3, %v1329_v63, 2147483647  ;;  %v1321_v63 = vadd.f32 %v1320_v53, %v4590_v41 }
 0x965   :  { %v1332_v34 = vshra.s32 %v1330_v38, 16  ;;  %v1331_v43 = vand.u32 65535, %v1330_v38 }
 0x966   :  { %v1357_v35 = vcombine.high %v1356_v9, %v1356_v9  ;;  %v1364_v15 = vrot.slane %v1356_v9, %v4629_v47 }
 0x967   :  { %v1334_v40 = vcvt.s32.f32 %v1332_v34  ;;  %v1333_v45 = vcvt.s32.f32 %v1331_v43 }
 0x968   :  { %v1371_v42 = vrot.slane %v1357_v35, %v4629_v47  ;;  %1374 = vst.msk [vmem:[%s5298_s6 + $0x2] sm:$0x1] %vm651_vm5, %v1364_v15 }
 0x969   :  { %1335 = vmin.xlane.f32.xlu1 %v1334_v40 }
 0x96a   :  { %1375 = vst.msk [vmem:[%s5298_s6 + $0x12] sm:$0x1] %vm651_vm5, %v1371_v42  ;;  %v1323_v42 = vadd.f32 %v1322_v55, %v4594_v57 }
 0x9f2   :  { %v1336_v44 = vpop.xlane.xlu1 %1335 }
 0x9f3   :  { %vm1337_vm12 = vcmp.eq.f32.partialorder %v1334_v40, %v1336_v44  ;;  %v1342_v48 = vcvt.f32.s32 %v1336_v44 }
 0x9f4   :  { %v1338_v46 = vsel %vm1337_vm12, %v1333_v45, inf }
 0x9f5   :  { %1339 = vmin.xlane.f32.xlu0 %v1338_v46  ;;  %v1343_v50 = vshll.u32 %v1342_v48, 16 }
 0xa7e   :  { %v1340_v49 = vpop.xlane.xlu0 %1339 }
 0xa7f   :  { %v1341_v36 = vcvt.f32.s32 %v1340_v49 }
 0xa81   :  { %v1344_v51 = vadd.s32 %v1343_v50, %v1341_v36 }
 0xa83   :  { %vm1345_vm13 = vcmp.eq.s32.totalorder %v4504_v19, %v1344_v51 }
 0xa84   :  { %v3897_v52 = vsel %vm1345_vm13, 1.0, %v4397_v0 }
 0xa85   :  { %3898 = vmatmul.mubr.msk.f32.vlgmr.msra.gmra.mxu0 %vm146_vm0, %v3897_v52  ;;  %4042 = vmatmul.mubr.msk.f32.vlgmr.msra.gmra.mxu1 %vm146_vm0, %v3897_v52 }
 0xa86   :  { %1569 = vmatpush1.msra.mxu0 %v4457_v2  ;;  %1640 = vmatpush1.msra.mxu1 %v4472_v8 }
 0xa87   :  { %1570 = vmatprep.subr.mxu0 %v4459_v3  ;;  %1641 = vmatprep.subr.mxu1 %v4478_v11 }
 0xa88   :  { %1571 = vmatpush1.msra.mxu0 %v4462_v4  ;;  %1642 = vmatpush1.msra.mxu1 %v4484_v13 }
 0xa89   :  { %1572 = vmatprep.subr.mxu0 %v4465_v5  ;;  %1643 = vmatprep.subr.mxu1 %v4486_v14 }
 0xa8a   :  { %1573 = vmatpush1.msra.mxu0 %v4468_v6  ;;  %1644 = vmatpush1.msra.mxu1 %v4501_v18 }
 0xa8b   :  { %1574 = vmatprep.subr.mxu0 %v4475_v10  ;;  %1645 = vmatprep.subr.mxu1 %v4510_v21 }
 0xa8c   :  { %1575 = vmatpush1.msra.mxu0 %v4481_v12  ;;  %1608 = vmatprep.mubr.f32.mxu0 %v4397_v0 }
 0xa8d   :  { %1646 = vmatpush1.msra.mxu1 %v4517_v23  ;;  %1679 = vmatprep.mubr.f32.mxu1 %v4397_v0 }
 0xa8e   :  { %1764 = vmatprep.subr.mxu0 %v4494_v16  ;;  %4044 = vmatprep.subr.mxu1 %v4397_v0 }
 0xb45   :  { %v1445_v33 = vpop.f32.mrf.mxu0  ;;  %v1516_v29 = vpop.f32.mrf.mxu1 }
 0xb46   :  { %v1520_v59 = vadd.f32 %v1445_v33, %v1252_v56 }
 0xb47   :  { %v4043_v60 = vpop.f32.mrf.mxu1  ;;  %v1447_v62 = vpop.f32.mrf.mxu0 }
 0xb48   :  { %v3900_v61 = vmul.f32 -1.442695, %v1520_v59  ;;  %v1521_v9 = vadd.f32 %v1447_v62, %v1321_v63 }
 0xb4a   :  { %4165 = vpow2.f32 %v3900_v61  ;;  %v3901_v38 = vmul.f32 -1.442695, %v1521_v9 }
 0xb4c   :  { %4167 = vpow2.f32 %v3901_v38 }
 0xb57   :  { %v4166_v34 = vpop.eup %4165 }
 0xb58   :  { %v1528_v35 = vadd.f32 1.0, %v4166_v34 }
 0xb59   :  { %v4168_v15 = vpop.eup %4167 }
 0xb5a   :  { %4169 = vrcp.f32 %v1528_v35  ;;  %v1529_v40 = vadd.f32 1.0, %v4168_v15 }
 0xb5c   :  { %4171 = vrcp.f32 %v1529_v40 }
 0xb67   :  { %v4170_v43 = vpop.eup %4169 }
 0xb68   :  { %v1534_v44 = vmul.f32 %v4170_v43, %v1323_v42 }
 0xb69   :  { %v4172_v46 = vpop.eup %4171 }
 0xb6a   :  { %v1535_v45 = vadd.f32 %v1534_v44, %v1516_v29  ;;  %v1537_v48 = vsub.f32 1.0, %v4172_v46  ;;  %v1539_v36 = vmul.f32 %v4172_v46, %v4736_v58 }
 0xb6c   :  { %4173 = vtanh.f32 %v1535_v45 }
 0xb79   :  { %v4174_v49 = vpop.eup %4173 }
 0xb7a   :  { %v1538_v50 = vmul.f32 %v4174_v49, %v1537_v48 }
 0xb7c   :  { %v4802_v51 = vadd.f32 %v1539_v36, %v1538_v50  ;;  %v4874_v50 = vld [vmem:[#allocation2 + $0x48] sm:$0xff]  ;;  %v4878_v36 = vld [vmem:[#allocation2 + $0x38] sm:$0xff] }
 0xb7e   :  { %3902 = vmatmul.mubr.msk.f32.vlgmr.msra.gmra.mxu0 %vm146_vm0, %v4802_v51  ;;  %3903 = vmatmul.mubr.msk.f32.vlgmr.msra.gmra.mxu1 %vm146_vm0, %v4802_v51 }
 0xb7f   :  { %1765 = vmatpush1.msra.mxu0 %v4498_v17  ;;  %4045 = vmatpush3.msra.mxu1 %v4536_v28 }
 0xb80   :  { %1766 = vmatprep.subr.mxu0 %v4507_v20  ;;  %4046 = vmatprep.subr.mxu1 %v4397_v0 }
 0xb81   :  { %1767 = vmatpush1.msra.mxu0 %v4515_v22  ;;  %4047 = vmatpush3.msra.mxu1 %v4544_v30 }
 0xb82   :  { %1768 = vmatprep.subr.mxu0 %v4520_v24  ;;  %4048 = vmatprep.subr.mxu1 %v4397_v0 }
 0xb83   :  { %1769 = vmatpush1.msra.mxu0 %v4524_v25  ;;  %4049 = vmatpush3.msra.mxu1 %v4550_v31 }
 0xb84   :  { %1770 = vmatprep.subr.mxu0 %v4529_v26  ;;  %4050 = vmatprep.subr.mxu1 %v4397_v0 }
 0xb85   :  { %1771 = vmatpush1.msra.mxu0 %v4533_v27  ;;  %1804 = vmatprep.mubr.f32.mxu0 %v4397_v0 }
 0xb86   :  { %4051 = vmatpush3.msra.mxu1 %v4556_v32  ;;  %4052 = vmatprep.mubr.msk.f32.mxu1 %vm4398_vm2, %v4397_v0 }
 0xb87   :  { %1929 = vmatprep.subr.mxu0 %v4455_v1  ;;  %2000 = vmatprep.subr.mxu1 %v4470_v7 }
 0xc3e   :  { %v1610_v17 = vpop.f32.mrf.mxu0 }
 0xc3f   :  { %v1611_v20 = vadd.f32 %v1610_v17, %v4624_v39  ;;  %v4886_v17 = vld [vmem:[#allocation2 + $0x20] sm:$0xff] }
 0xc41   :  { %v1686_v22 = vsel %vm601_vm3, %v1611_v20, -inf }
 0xc42   :  { %1687 = vmax.xlane.f32.xlu1 %v1686_v22  ;;  %v4898_v22 = vld [vmem:[#allocation2] sm:$0xff] }
 0xccb   :  { %v1688_v24 = vpop.xlane.xlu1 %1687 }
 0xccc   :  { %vm1689_vm14 = vcmp.eq.f32.partialorder %v1611_v20, %v1688_v24  ;;  %v1709_v25 = vsub.f32 %v1611_v20, %v1688_v24  ;;  %v4890_v20 = vld [vmem:[#allocation2 + $0x18] sm:$0xff] }
 0xccd   :  { %v1690_v26 = vsel %vm1689_vm14, %v4504_v19, 32 }
 0xcce   :  { %v1717_v27 = vrot.slane %v1709_v25, %v4629_v47  ;;  %v1691_v58 = vsel %vm601_vm3, %v1690_v26, 2147483647 }
 0xccf   :  { %v1693_v52 = vshra.s32 %v1691_v58, 16  ;;  %v1692_v55 = vand.u32 65535, %v1691_v58 }
 0xcd0   :  { %v1718_v53 = vcombine.high %v1717_v27, %v1717_v27  ;;  %v1725_v1 = vrot.slane %v1717_v27, %v4629_v47 }
 0xcd1   :  { %v1695_v7 = vcvt.s32.f32 %v1693_v52  ;;  %v1694_v33 = vcvt.s32.f32 %v1692_v55 }
 0xcd2   :  { %v1732_v54 = vrot.slane %v1718_v53, %v4629_v47  ;;  %1735 = vst.msk [vmem:[%s5298_s6 + $0x3] sm:$0x1] %vm651_vm5, %v1725_v1 }
 0xcd3   :  { %1696 = vmin.xlane.f32.xlu0 %v1695_v7 }
 0xcd4   :  { %1736 = vst.msk [vmem:[%s5298_s6 + $0x13] sm:$0x1] %vm651_vm5, %v1732_v54 }
 0xd5c   :  { %v1697_v56 = vpop.xlane.xlu0 %1696 }
 0xd5d   :  { %vm1698_vm15 = vcmp.eq.f32.partialorder %v1695_v7, %v1697_v56  ;;  %v1703_v59 = vcvt.f32.s32 %v1697_v56 }
 0xd5e   :  { %v1699_v29 = vsel %vm1698_vm15, %v1694_v33, inf }
 0xd5f   :  { %1700 = vmin.xlane.f32.xlu1 %v1699_v29  ;;  %v1704_v61 = vshll.u32 %v1703_v59, 16 }
 0xde8   :  { %v1701_v60 = vpop.xlane.xlu1 %1700 }
 0xde9   :  { %v1702_v62 = vcvt.f32.s32 %v1701_v60 }
 0xdeb   :  { %v1705_v63 = vadd.s32 %v1704_v61, %v1702_v62 }
 0xded   :  { %vm1706_vm1 = vcmp.eq.s32.totalorder %v4504_v19, %v1705_v63 }
 0xdee   :  { %v3904_v9 = vsel %vm1706_vm1, 1.0, %v4397_v0 }
 0xdef   :  { %3905 = vmatmul.mubr.msk.f32.vlgmr.msra.gmra.mxu0 %vm146_vm0, %v3904_v9  ;;  %4053 = vmatmul.mubr.msk.f32.vlgmr.msra.gmra.mxu1 %vm146_vm0, %v3904_v9 }
 0xdf0   :  { %1930 = vmatpush1.msra.mxu0 %v4457_v2  ;;  %2001 = vmatpush1.msra.mxu1 %v4472_v8  ;;  %v1681_v2 = vpop.f32.mrf.mxu1 }
 0xdf1   :  { %1931 = vmatprep.subr.mxu0 %v4459_v3  ;;  %2002 = vmatprep.subr.mxu1 %v4478_v11  ;;  %v1612_v3 = vpop.f32.mrf.mxu0 }
 0xdf2   :  { %1932 = vmatpush1.msra.mxu0 %v4462_v4  ;;  %2003 = vmatpush1.msra.mxu1 %v4484_v13  ;;  %v1683_v4 = vpop.f32.mrf.mxu1 }
 0xdf3   :  { %1933 = vmatprep.subr.mxu0 %v4465_v5  ;;  %2004 = vmatprep.subr.mxu1 %v4486_v14  ;;  %v1613_v5 = vadd.f32 %v1612_v3, %v4586_v37  ;;  %v1682_v14 = vadd.f32 %v1681_v2, %v4590_v41  ;;  %v1684_v35 = vadd.f32 %v1683_v4, %v4594_v57  ;;  %v4930_v4 = vld [vmem:[#allocation5 + $0x60] sm:$0xff] }
 0xdf4   :  { %1934 = vmatpush1.msra.mxu0 %v4468_v6  ;;  %2005 = vmatpush1.msra.mxu1 %v4501_v18 }
 0xdf5   :  { %1935 = vmatprep.subr.mxu0 %v4475_v10  ;;  %2006 = vmatprep.subr.mxu1 %v4510_v21 }
 0xdf6   :  { %1936 = vmatpush1.msra.mxu0 %v4481_v12  ;;  %1969 = vmatprep.mubr.f32.mxu0 %v4397_v0 }
 0xdf7   :  { %2007 = vmatpush1.msra.mxu1 %v4517_v23  ;;  %2040 = vmatprep.mubr.f32.mxu1 %v4397_v0 }
 0xdf8   :  { %2125 = vmatprep.subr.mxu0 %v4494_v16  ;;  %4055 = vmatprep.subr.mxu1 %v4397_v0 }
 0xeaf   :  { %v1806_v6 = vpop.f32.mrf.mxu0  ;;  %v1877_v8 = vpop.f32.mrf.mxu1 }
 0xeb0   :  { %v1881_v10 = vadd.f32 %v1806_v6, %v1613_v5  ;;  %v4933_v5 = vld [vmem:[#allocation5 + $0x70] sm:$0xff]  ;;  %v4936_v6 = vld [vmem:[#allocation5 + $0x48] sm:$0xff] }
 0xeb1   :  { %v4054_v11 = vpop.f32.mrf.mxu1  ;;  %v1808_v13 = vpop.f32.mrf.mxu0 }
 0xeb2   :  { %v3907_v12 = vmul.f32 -1.442695, %v1881_v10  ;;  %v1882_v18 = vadd.f32 %v1808_v13, %v1682_v14  ;;  %v4942_v10 = vld [vmem:[#allocation5 + $0x40] sm:$0xff]  ;;  %v4945_v11 = vld [vmem:[#allocation5 + $0x50] sm:$0xff]  ;;  %v4951_v13 = vld [vmem:[#allocation5 + $0x38] sm:$0xff] }
 0xeb3   :  { %v4954_v14 = vld [vmem:[#allocation5 + $0x20] sm:$0xff] }
 0xeb4   :  { %4175 = vpow2.f32 %v3907_v12  ;;  %v3908_v21 = vmul.f32 -1.442695, %v1882_v18  ;;  %v4948_v12 = vld [vmem:[#allocation5 + $0x28] sm:$0xff]  ;;  %v4957_v18 = vld [vmem:[#allocation5 + $0x30] sm:$0xff] }
 0xeb6   :  { %4177 = vpow2.f32 %v3908_v21  ;;  %v4960_v21 = vld [vmem:[#allocation5 + $0x8] sm:$0xff] }
 0xec1   :  { %v4176_v16 = vpop.eup %4175 }
 0xec2   :  { %v1889_v23 = vadd.f32 1.0, %v4176_v16  ;;  %v4963_v16 = vld [vmem:[#allocation5 + $0x18] sm:$0xff] }
 0xec3   :  { %v4178_v38 = vpop.eup %4177 }
 0xec4   :  { %4179 = vrcp.f32 %v1889_v23  ;;  %v1890_v34 = vadd.f32 1.0, %v4178_v38  ;;  %v4966_v23 = vld [vmem:[#allocation5] sm:$0xff]  ;;  %v4970_v38 = vld [vmem:[#allocation5 + $0x10] sm:$0xff] }
 0xec6   :  { %4181 = vrcp.f32 %v1890_v34  ;;  %v4974_v34 = vld [vmem:[#allocation2 + $0x50] sm:$0xff] }
 0xed1   :  { %v4180_v15 = vpop.eup %4179 }
 0xed2   :  { %v1895_v40 = vmul.f32 %v4180_v15, %v1684_v35 }
 0xed3   :  { %v4182_v43 = vpop.eup %4181 }
 0xed4   :  { %v1896_v42 = vadd.f32 %v1895_v40, %v1877_v8  ;;  %v1898_v44 = vsub.f32 1.0, %v4182_v43  ;;  %v1900_v48 = vmul.f32 %v4182_v43, %v4802_v51  ;;  %v4882_v51 = vld [vmem:[#allocation2 + $0x30] sm:$0xff]  ;;  %v4939_v8 = vld [vmem:[#allocation5 + $0x58] sm:$0xff] }
 0xed6   :  { %4183 = vtanh.f32 %v1896_v42 }
 0xee3   :  { %v4184_v45 = vpop.eup %4183 }
 0xee4   :  { %v1899_v46 = vmul.f32 %v4184_v45, %v1898_v44 }
 0xee6   :  { %v4868_v49 = vadd.f32 %v1900_v48, %v1899_v46 }
 0xee8   :  { %3909 = vmatmul.mubr.msk.f32.vlgmr.msra.gmra.mxu0 %vm146_vm0, %v4868_v49  ;;  %3910 = vmatmul.mubr.msk.f32.vlgmr.msra.gmra.mxu1 %vm146_vm0, %v4868_v49 }
 0xee9   :  { %2126 = vmatpush1.msra.mxu0 %v4874_v50  ;;  %4056 = vmatpush3.msra.mxu1 %v4536_v28  ;;  %v4894_v28 = vld [vmem:[#allocation2 + $0x8] sm:$0xff] }
 0xeea   :  { %2127 = vmatprep.subr.mxu0 %v4878_v36  ;;  %4057 = vmatprep.subr.mxu1 %v4397_v0 }
 0xeeb   :  { %2128 = vmatpush1.msra.mxu0 %v4882_v51  ;;  %4058 = vmatpush3.msra.mxu1 %v4544_v30  ;;  %v4905_v30 = vld [vmem:[#allocation5 + $0x68] sm:$0xff] }
 0xeec   :  { %2129 = vmatprep.subr.mxu0 %v4886_v17  ;;  %4059 = vmatprep.subr.mxu1 %v4397_v0 }
 0xeed   :  { %2130 = vmatpush1.msra.mxu0 %v4890_v20  ;;  %4060 = vmatpush3.msra.mxu1 %v4550_v31  ;;  %v4908_v31 = vld [vmem:[#allocation5 + $0x78] sm:$0xff] }
 0xeee   :  { %2131 = vmatprep.subr.mxu0 %v4894_v28  ;;  %4061 = vmatprep.subr.mxu1 %v4397_v0 }
 0xeef   :  { %2132 = vmatpush1.msra.mxu0 %v4898_v22  ;;  %2165 = vmatprep.mubr.f32.mxu0 %v4397_v0 }
 0xef0   :  { %4062 = vmatpush3.msra.mxu1 %v4556_v32  ;;  %4063 = vmatprep.mubr.msk.f32.mxu1 %vm4398_vm2, %v4397_v0 }
 0xef1   :  { %2290 = vmatprep.subr.mxu0 %v4905_v30  ;;  %2361 = vmatprep.subr.mxu1 %v4908_v31 }
 0xfa8   :  { %v1971_v24 = vpop.f32.mrf.mxu0  ;;  %v2042_v35 = vpop.f32.mrf.mxu1 }
 0xfa9   :  { %v1972_v25 = vadd.f32 %v1971_v24, %v4624_v39 }
 0xfaa   :  { %v1973_v15 = vpop.f32.mrf.mxu0  ;;  %v2044_v40 = vpop.f32.mrf.mxu1 }
 0xfab   :  { %v2047_v26 = vsel %vm601_vm3, %v1972_v25, -inf  ;;  %v1974_v42 = vadd.f32 %v1973_v15, %v4586_v37 }
 0xfac   :  { %2048 = vmax.xlane.f32.xlu0 %v2047_v26 }
0x1035   :  { %v2049_v27 = vpop.xlane.xlu0 %2048 }
0x1036   :  { %vm2050_vm4 = vcmp.eq.f32.partialorder %v1972_v25, %v2049_v27  ;;  %v2070_v32 = vsub.f32 %v1972_v25, %v2049_v27  ;;  %v2043_v25 = vadd.f32 %v2042_v35, %v4590_v41 }
0x1037   :  { %v2051_v58 = vsel %vm2050_vm4, %v4504_v19, 32 }
0x1038   :  { %v2078_v52 = vrot.slane %v2070_v32, %v4629_v47  ;;  %v2052_v53 = vsel %vm601_vm3, %v2051_v58, 2147483647 }
0x1039   :  { %v2054_v1 = vshra.s32 %v2052_v53, 16  ;;  %v2053_v33 = vand.u32 65535, %v2052_v53 }
0x103a   :  { %v2079_v7 = vcombine.high %v2078_v52, %v2078_v52  ;;  %v2086_v54 = vrot.slane %v2078_v52, %v4629_v47 }
0x103b   :  { %v2056_v55 = vcvt.s32.f32 %v2054_v1  ;;  %v2055_v59 = vcvt.s32.f32 %v2053_v33  ;;  %v2045_v1 = vadd.f32 %v2044_v40, %v4594_v57 }
0x103c   :  { %v2093_v56 = vrot.slane %v2079_v7, %v4629_v47  ;;  %2096 = vst.msk [vmem:[%s5298_s6 + $0x4] sm:$0x1] %vm651_vm5, %v2086_v54 }
0x103d   :  { %2057 = vmin.xlane.f32.xlu1 %v2056_v55 }
0x103e   :  { %2097 = vst.msk [vmem:[%s5298_s6 + $0x14] sm:$0x1] %vm651_vm5, %v2093_v56 }
0x10c6   :  { %v2058_v29 = vpop.xlane.xlu1 %2057 }
0x10c7   :  { %vm2059_vm6 = vcmp.eq.f32.partialorder %v2056_v55, %v2058_v29  ;;  %v2064_v61 = vcvt.f32.s32 %v2058_v29 }
0x10c8   :  { %v2060_v60 = vsel %vm2059_vm6, %v2055_v59, inf }
0x10c9   :  { %2061 = vmin.xlane.f32.xlu0 %v2060_v60  ;;  %v2065_v63 = vshll.u32 %v2064_v61, 16 }
0x1152   :  { %v2062_v62 = vpop.xlane.xlu0 %2061 }
0x1153   :  { %v2063_v9 = vcvt.f32.s32 %v2062_v62  ;;  %v4989_v62 = vld [vmem:[#allocation2 + $0x58] sm:$0xff] }
0x1155   :  { %v2066_v2 = vadd.s32 %v2065_v63, %v2063_v9  ;;  %v5001_v63 = vld [vmem:[#allocation2 + $0x28] sm:$0xff]  ;;  %v5008_v9 = vld [vmem:[#allocation2 + $0x10] sm:$0xff] }
0x1157   :  { %vm2067_vm7 = vcmp.eq.s32.totalorder %v4504_v19, %v2066_v2 }
0x1158   :  { %v3911_v3 = vsel %vm2067_vm7, 1.0, %v4397_v0 }
0x1159   :  { %3912 = vmatmul.mubr.msk.f32.vlgmr.msra.gmra.mxu0 %vm146_vm0, %v3911_v3  ;;  %4064 = vmatmul.mubr.msk.f32.vlgmr.msra.gmra.mxu1 %vm146_vm0, %v3911_v3 }
0x115a   :  { %2291 = vmatpush1.msra.mxu0 %v4930_v4  ;;  %2362 = vmatpush1.msra.mxu1 %v4933_v5 }
0x115b   :  { %2292 = vmatprep.subr.mxu0 %v4936_v6  ;;  %2363 = vmatprep.subr.mxu1 %v4939_v8 }
0x115c   :  { %2293 = vmatpush1.msra.mxu0 %v4942_v10  ;;  %2364 = vmatpush1.msra.mxu1 %v4945_v11 }
0x115d   :  { %2294 = vmatprep.subr.mxu0 %v4948_v12  ;;  %2365 = vmatprep.subr.mxu1 %v4951_v13 }
0x115e   :  { %2295 = vmatpush1.msra.mxu0 %v4954_v14  ;;  %2366 = vmatpush1.msra.mxu1 %v4957_v18 }
0x115f   :  { %2296 = vmatprep.subr.mxu0 %v4960_v21  ;;  %2367 = vmatprep.subr.mxu1 %v4963_v16 }
0x1160   :  { %2297 = vmatpush1.msra.mxu0 %v4966_v23  ;;  %2330 = vmatprep.mubr.f32.mxu0 %v4397_v0 }
0x1161   :  { %2368 = vmatpush1.msra.mxu1 %v4970_v38  ;;  %2401 = vmatprep.mubr.f32.mxu1 %v4397_v0 }
0x1162   :  { %2486 = vmatprep.subr.mxu0 %v4974_v34  ;;  %4066 = vmatprep.subr.mxu1 %v4397_v0 }
0x1219   :  { %v2167_v43 = vpop.f32.mrf.mxu0  ;;  %v2238_v44 = vpop.f32.mrf.mxu1 }
0x121a   :  { %v2242_v45 = vadd.f32 %v2167_v43, %v1974_v42 }
0x121b   :  { %v4065_v46 = vpop.f32.mrf.mxu1  ;;  %v2169_v24 = vpop.f32.mrf.mxu0 }
0x121c   :  { %v3914_v48 = vmul.f32 -1.442695, %v2242_v45  ;;  %v2243_v26 = vadd.f32 %v2169_v24, %v2043_v25 }
0x121e   :  { %4185 = vpow2.f32 %v3914_v48  ;;  %v3915_v27 = vmul.f32 -1.442695, %v2243_v26 }
0x1220   :  { %4187 = vpow2.f32 %v3915_v27 }
0x122b   :  { %v4186_v32 = vpop.eup %4185 }
0x122c   :  { %v2250_v58 = vadd.f32 1.0, %v4186_v32 }
0x122d   :  { %v4188_v52 = vpop.eup %4187 }
0x122e   :  { %4189 = vrcp.f32 %v2250_v58  ;;  %v2251_v53 = vadd.f32 1.0, %v4188_v52 }
0x1230   :  { %4191 = vrcp.f32 %v2251_v53 }
0x123b   :  { %v4190_v7 = vpop.eup %4189 }
0x123c   :  { %v2256_v54 = vmul.f32 %v4190_v7, %v2045_v1 }
0x123d   :  { %v4192_v56 = vpop.eup %4191 }
0x123e   :  { %v2257_v55 = vadd.f32 %v2256_v54, %v2238_v44  ;;  %v2259_v33 = vsub.f32 1.0, %v4192_v56  ;;  %v2261_v60 = vmul.f32 %v4192_v56, %v4868_v49  ;;  %v4995_v49 = vld [vmem:[#allocation2 + $0x40] sm:$0xff] }
0x1240   :  { %4193 = vtanh.f32 %v2257_v55 }
0x124d   :  { %v4194_v29 = vpop.eup %4193 }
0x124e   :  { %v2260_v59 = vmul.f32 %v4194_v29, %v2259_v33 }
0x1250   :  { %v4982_v61 = vadd.f32 %v2261_v60, %v2260_v59 }
0x1252   :  { %3916 = vmatmul.mubr.msk.f32.vlgmr.msra.gmra.mxu0 %vm146_vm0, %v4982_v61  ;;  %3917 = vmatmul.mubr.msk.f32.vlgmr.msra.gmra.mxu1 %vm146_vm0, %v4982_v61 }
0x1253   :  { %2487 = vmatpush1.msra.mxu0 %v4874_v50  ;;  %4067 = vmatpush3.msra.mxu1 %v4989_v62 }
0x1254   :  { %2488 = vmatprep.subr.mxu0 %v4878_v36  ;;  %4068 = vmatprep.subr.mxu1 %v4397_v0 }
0x1255   :  { %2489 = vmatpush1.msra.mxu0 %v4882_v51  ;;  %4069 = vmatpush3.msra.mxu1 %v4995_v49 }
0x1256   :  { %2490 = vmatprep.subr.mxu0 %v4886_v17  ;;  %4070 = vmatprep.subr.mxu1 %v4397_v0 }
0x1257   :  { %2491 = vmatpush1.msra.mxu0 %v4890_v20  ;;  %4071 = vmatpush3.msra.mxu1 %v5001_v63 }
0x1258   :  { %2492 = vmatprep.subr.mxu0 %v4894_v28  ;;  %4072 = vmatprep.subr.mxu1 %v4397_v0 }
0x1259   :  { %2493 = vmatpush1.msra.mxu0 %v4898_v22  ;;  %2526 = vmatprep.mubr.f32.mxu0 %v4397_v0 }
0x125a   :  { %4073 = vmatpush3.msra.mxu1 %v5008_v9  ;;  %4074 = vmatprep.mubr.msk.f32.mxu1 %vm4398_vm2, %v4397_v0 }
0x125b   :  { %2651 = vmatprep.subr.mxu0 %v4905_v30  ;;  %2722 = vmatprep.subr.mxu1 %v4908_v31 }
0x1312   :  { %v2332_v2 = vpop.f32.mrf.mxu0  ;;  %v2403_v56 = vpop.f32.mrf.mxu1 }
0x1313   :  { %v2333_v3 = vadd.f32 %v2332_v2, %v4624_v39 }
0x1314   :  { %v2334_v33 = vpop.f32.mrf.mxu0  ;;  %v2405_v29 = vpop.f32.mrf.mxu1 }
0x1315   :  { %v2408_v35 = vsel %vm601_vm3, %v2333_v3, -inf  ;;  %v2335_v59 = vadd.f32 %v2334_v33, %v4586_v37 }
0x1316   :  { %2409 = vmax.xlane.f32.xlu1 %v2408_v35 }
0x139f   :  { %v2410_v15 = vpop.xlane.xlu1 %2409 }
0x13a0   :  { %vm2411_vm8 = vcmp.eq.f32.partialorder %v2333_v3, %v2410_v15  ;;  %v2431_v40 = vsub.f32 %v2333_v3, %v2410_v15 }
0x13a1   :  { %v2412_v42 = vsel %vm2411_vm8, %v4504_v19, 32 }
0x13a2   :  { %v2439_v43 = vrot.slane %v2431_v40, %v4629_v47  ;;  %v2413_v44 = vsel %vm601_vm3, %v2412_v42, 2147483647  ;;  %v2404_v42 = vadd.f32 %v2403_v56, %v4590_v41 }
0x13a3   :  { %v2415_v45 = vshra.s32 %v2413_v44, 16  ;;  %v2414_v26 = vand.u32 65535, %v2413_v44 }
0x13a4   :  { %v2440_v46 = vcombine.high %v2439_v43, %v2439_v43  ;;  %v2447_v48 = vrot.slane %v2439_v43, %v4629_v47 }
0x13a5   :  { %v2417_v24 = vcvt.s32.f32 %v2415_v45  ;;  %v2416_v32 = vcvt.s32.f32 %v2414_v26 }
0x13a6   :  { %v2454_v25 = vrot.slane %v2440_v46, %v4629_v47  ;;  %2457 = vst.msk [vmem:[%s5298_s6 + $0x5] sm:$0x1] %vm651_vm5, %v2447_v48 }
0x13a7   :  { %2418 = vmin.xlane.f32.xlu0 %v2417_v24 }
0x13a8   :  { %2458 = vst.msk [vmem:[%s5298_s6 + $0x15] sm:$0x1] %vm651_vm5, %v2454_v25  ;;  %v2406_v25 = vadd.f32 %v2405_v29, %v4594_v57 }
0x1430   :  { %v2419_v27 = vpop.xlane.xlu0 %2418 }
0x1431   :  { %vm2420_vm9 = vcmp.eq.f32.partialorder %v2417_v24, %v2419_v27  ;;  %v2425_v52 = vcvt.f32.s32 %v2419_v27 }
0x1432   :  { %v2421_v58 = vsel %vm2420_vm9, %v2416_v32, inf }
0x1433   :  { %2422 = vmin.xlane.f32.xlu1 %v2421_v58  ;;  %v2426_v1 = vshll.u32 %v2425_v52, 16 }
0x14bc   :  { %v2423_v53 = vpop.xlane.xlu1 %2422 }
0x14bd   :  { %v2424_v7 = vcvt.f32.s32 %v2423_v53 }
0x14bf   :  { %v2427_v54 = vadd.s32 %v2426_v1, %v2424_v7 }
0x14c1   :  { %vm2428_vm10 = vcmp.eq.s32.totalorder %v4504_v19, %v2427_v54 }
0x14c2   :  { %v3918_v55 = vsel %vm2428_vm10, 1.0, %v4397_v0 }
0x14c3   :  { %3919 = vmatmul.mubr.msk.f32.vlgmr.msra.gmra.mxu0 %vm146_vm0, %v3918_v55  ;;  %4075 = vmatmul.mubr.msk.f32.vlgmr.msra.gmra.mxu1 %vm146_vm0, %v3918_v55 }
0x14c4   :  { %2652 = vmatpush1.msra.mxu0 %v4930_v4  ;;  %2723 = vmatpush1.msra.mxu1 %v4933_v5 }
0x14c5   :  { %2653 = vmatprep.subr.mxu0 %v4936_v6  ;;  %2724 = vmatprep.subr.mxu1 %v4939_v8 }
0x14c6   :  { %2654 = vmatpush1.msra.mxu0 %v4942_v10  ;;  %2725 = vmatpush1.msra.mxu1 %v4945_v11 }
0x14c7   :  { %2655 = vmatprep.subr.mxu0 %v4948_v12  ;;  %2726 = vmatprep.subr.mxu1 %v4951_v13 }
0x14c8   :  { %2656 = vmatpush1.msra.mxu0 %v4954_v14  ;;  %2727 = vmatpush1.msra.mxu1 %v4957_v18 }
0x14c9   :  { %2657 = vmatprep.subr.mxu0 %v4960_v21  ;;  %2728 = vmatprep.subr.mxu1 %v4963_v16 }
0x14ca   :  { %2658 = vmatpush1.msra.mxu0 %v4966_v23  ;;  %2691 = vmatprep.mubr.f32.mxu0 %v4397_v0 }
0x14cb   :  { %2729 = vmatpush1.msra.mxu1 %v4970_v38  ;;  %2762 = vmatprep.mubr.f32.mxu1 %v4397_v0 }
0x14cc   :  { %2847 = vmatprep.subr.mxu0 %v4974_v34  ;;  %4077 = vmatprep.subr.mxu1 %v4397_v0 }
0x1583   :  { %v2528_v60 = vpop.f32.mrf.mxu0  ;;  %v2599_v2 = vpop.f32.mrf.mxu1 }
0x1584   :  { %v2603_v3 = vadd.f32 %v2528_v60, %v2335_v59 }
0x1585   :  { %v4076_v35 = vpop.f32.mrf.mxu1  ;;  %v2530_v40 = vpop.f32.mrf.mxu0 }
0x1586   :  { %v3921_v15 = vmul.f32 -1.442695, %v2603_v3  ;;  %v2604_v43 = vadd.f32 %v2530_v40, %v2404_v42 }
0x1588   :  { %4195 = vpow2.f32 %v3921_v15  ;;  %v3922_v44 = vmul.f32 -1.442695, %v2604_v43 }
0x158a   :  { %4197 = vpow2.f32 %v3922_v44 }
0x1595   :  { %v4196_v45 = vpop.eup %4195 }
0x1596   :  { %v2611_v46 = vadd.f32 1.0, %v4196_v45 }
0x1597   :  { %v4198_v48 = vpop.eup %4197 }
0x1598   :  { %4199 = vrcp.f32 %v2611_v46  ;;  %v2612_v24 = vadd.f32 1.0, %v4198_v48 }
0x159a   :  { %4201 = vrcp.f32 %v2612_v24 }
0x15a5   :  { %v4200_v26 = vpop.eup %4199 }
0x15a6   :  { %v2617_v27 = vmul.f32 %v4200_v26, %v2406_v25 }
0x15a7   :  { %v4202_v58 = vpop.eup %4201 }
0x15a8   :  { %v2618_v32 = vadd.f32 %v2617_v27, %v2599_v2  ;;  %v2620_v52 = vsub.f32 1.0, %v4202_v58  ;;  %v2622_v7 = vmul.f32 %v4202_v58, %v4982_v61 }
0x15aa   :  { %4203 = vtanh.f32 %v2618_v32 }
0x15b7   :  { %v4204_v53 = vpop.eup %4203 }
0x15b8   :  { %v2621_v1 = vmul.f32 %v4204_v53, %v2620_v52 }
0x15ba   :  { %v5056_v54 = vadd.f32 %v2622_v7, %v2621_v1 }
0x15bc   :  { %3923 = vmatmul.mubr.msk.f32.vlgmr.msra.gmra.mxu0 %vm146_vm0, %v5056_v54  ;;  %3924 = vmatmul.mubr.msk.f32.vlgmr.msra.gmra.mxu1 %vm146_vm0, %v5056_v54 }
0x15bd   :  { %2848 = vmatpush1.msra.mxu0 %v4874_v50  ;;  %4078 = vmatpush3.msra.mxu1 %v4989_v62 }
0x15be   :  { %2849 = vmatprep.subr.mxu0 %v4878_v36  ;;  %4079 = vmatprep.subr.mxu1 %v4397_v0 }
0x15bf   :  { %2850 = vmatpush1.msra.mxu0 %v4882_v51  ;;  %4080 = vmatpush3.msra.mxu1 %v4995_v49 }
0x15c0   :  { %2851 = vmatprep.subr.mxu0 %v4886_v17  ;;  %4081 = vmatprep.subr.mxu1 %v4397_v0 }
0x15c1   :  { %2852 = vmatpush1.msra.mxu0 %v4890_v20  ;;  %4082 = vmatpush3.msra.mxu1 %v5001_v63 }
0x15c2   :  { %2853 = vmatprep.subr.mxu0 %v4894_v28  ;;  %4083 = vmatprep.subr.mxu1 %v4397_v0 }
0x15c3   :  { %2854 = vmatpush1.msra.mxu0 %v4898_v22  ;;  %2887 = vmatprep.mubr.f32.mxu0 %v4397_v0 }
0x15c4   :  { %4084 = vmatpush3.msra.mxu1 %v5008_v9  ;;  %4085 = vmatprep.mubr.msk.f32.mxu1 %vm4398_vm2, %v4397_v0 }
0x15c5   :  { %3012 = vmatprep.subr.mxu0 %v4905_v30  ;;  %3083 = vmatprep.subr.mxu1 %v4908_v31 }
0x167c   :  { %v2693_v61 = vpop.f32.mrf.mxu0  ;;  %v2764_v58 = vpop.f32.mrf.mxu1 }
0x167d   :  { %v2694_v55 = vadd.f32 %v2693_v61, %v4624_v39 }
0x167e   :  { %v2695_v52 = vpop.f32.mrf.mxu0  ;;  %v2766_v53 = vpop.f32.mrf.mxu1 }
0x167f   :  { %v2769_v56 = vsel %vm601_vm3, %v2694_v55, -inf  ;;  %v2696_v1 = vadd.f32 %v2695_v52, %v4586_v37 }
0x1680   :  { %2770 = vmax.xlane.f32.xlu0 %v2769_v56 }
0x1709   :  { %v2771_v33 = vpop.xlane.xlu0 %2770 }
0x170a   :  { %vm2772_vm11 = vcmp.eq.f32.partialorder %v2694_v55, %v2771_v33  ;;  %v2792_v29 = vsub.f32 %v2694_v55, %v2771_v33 }
0x170b   :  { %v2773_v59 = vsel %vm2772_vm11, %v4504_v19, 32 }
0x170c   :  { %v2800_v60 = vrot.slane %v2792_v29, %v4629_v47  ;;  %v2774_v2 = vsel %vm601_vm3, %v2773_v59, 2147483647  ;;  %v2765_v59 = vadd.f32 %v2764_v58, %v4590_v41 }
0x170d   :  { %v2776_v3 = vshra.s32 %v2774_v2, 16  ;;  %v2775_v43 = vand.u32 65535, %v2774_v2 }
0x170e   :  { %v2801_v35 = vcombine.high %v2800_v60, %v2800_v60  ;;  %v2808_v15 = vrot.slane %v2800_v60, %v4629_v47 }
0x170f   :  { %v2778_v40 = vcvt.s32.f32 %v2776_v3  ;;  %v2777_v45 = vcvt.s32.f32 %v2775_v43 }
0x1710   :  { %v2815_v42 = vrot.slane %v2801_v35, %v4629_v47  ;;  %2818 = vst.msk [vmem:[%s5298_s6 + $0x6] sm:$0x1] %vm651_vm5, %v2808_v15 }
0x1711   :  { %2779 = vmin.xlane.f32.xlu1 %v2778_v40 }
0x1712   :  { %2819 = vst.msk [vmem:[%s5298_s6 + $0x16] sm:$0x1] %vm651_vm5, %v2815_v42  ;;  %v2767_v42 = vadd.f32 %v2766_v53, %v4594_v57 }
0x179a   :  { %v2780_v44 = vpop.xlane.xlu1 %2779 }
0x179b   :  { %vm2781_vm12 = vcmp.eq.f32.partialorder %v2778_v40, %v2780_v44  ;;  %v2786_v48 = vcvt.f32.s32 %v2780_v44 }
0x179c   :  { %v2782_v46 = vsel %vm2781_vm12, %v2777_v45, inf }
0x179d   :  { %2783 = vmin.xlane.f32.xlu0 %v2782_v46  ;;  %v2787_v25 = vshll.u32 %v2786_v48, 16 }
0x1826   :  { %v2784_v24 = vpop.xlane.xlu0 %2783 }
0x1827   :  { %v2785_v26 = vcvt.f32.s32 %v2784_v24 }
0x1829   :  { %v2788_v27 = vadd.s32 %v2787_v25, %v2785_v26 }
0x182b   :  { %vm2789_vm13 = vcmp.eq.s32.totalorder %v4504_v19, %v2788_v27 }
0x182c   :  { %v3925_v32 = vsel %vm2789_vm13, 1.0, %v4397_v0 }
0x182d   :  { %3926 = vmatmul.mubr.msk.f32.vlgmr.msra.gmra.mxu0 %vm146_vm0, %v3925_v32  ;;  %4086 = vmatmul.mubr.msk.f32.vlgmr.msra.gmra.mxu1 %vm146_vm0, %v3925_v32 }
0x182e   :  { %3013 = vmatpush1.msra.mxu0 %v4930_v4  ;;  %3084 = vmatpush1.msra.mxu1 %v4933_v5 }
0x182f   :  { %3014 = vmatprep.subr.mxu0 %v4936_v6  ;;  %3085 = vmatprep.subr.mxu1 %v4939_v8 }
0x1830   :  { %3015 = vmatpush1.msra.mxu0 %v4942_v10  ;;  %3086 = vmatpush1.msra.mxu1 %v4945_v11 }
0x1831   :  { %3016 = vmatprep.subr.mxu0 %v4948_v12  ;;  %3087 = vmatprep.subr.mxu1 %v4951_v13 }
0x1832   :  { %3017 = vmatpush1.msra.mxu0 %v4954_v14  ;;  %3088 = vmatpush1.msra.mxu1 %v4957_v18 }
0x1833   :  { %3018 = vmatprep.subr.mxu0 %v4960_v21  ;;  %3089 = vmatprep.subr.mxu1 %v4963_v16 }
0x1834   :  { %3019 = vmatpush1.msra.mxu0 %v4966_v23  ;;  %3052 = vmatprep.mubr.f32.mxu0 %v4397_v0 }
0x1835   :  { %3090 = vmatpush1.msra.mxu1 %v4970_v38  ;;  %3123 = vmatprep.mubr.f32.mxu1 %v4397_v0 }
0x1836   :  { %3208 = vmatprep.subr.mxu0 %v4974_v34  ;;  %4088 = vmatprep.subr.mxu1 %v4397_v0 }
0x18ed   :  { %v2889_v7 = vpop.f32.mrf.mxu0  ;;  %v2960_v61 = vpop.f32.mrf.mxu1 }
0x18ee   :  { %v2964_v55 = vadd.f32 %v2889_v7, %v2696_v1 }
0x18ef   :  { %v4087_v56 = vpop.f32.mrf.mxu1  ;;  %v2891_v29 = vpop.f32.mrf.mxu0 }
0x18f0   :  { %v3928_v33 = vmul.f32 -1.442695, %v2964_v55  ;;  %v2965_v60 = vadd.f32 %v2891_v29, %v2765_v59 }
0x18f2   :  { %4205 = vpow2.f32 %v3928_v33  ;;  %v3929_v2 = vmul.f32 -1.442695, %v2965_v60 }
0x18f4   :  { %4207 = vpow2.f32 %v3929_v2 }
0x18ff   :  { %v4206_v3 = vpop.eup %4205 }
0x1900   :  { %v2972_v35 = vadd.f32 1.0, %v4206_v3 }
0x1901   :  { %v4208_v15 = vpop.eup %4207 }
0x1902   :  { %4209 = vrcp.f32 %v2972_v35  ;;  %v2973_v40 = vadd.f32 1.0, %v4208_v15 }
0x1904   :  { %4211 = vrcp.f32 %v2973_v40 }
0x190f   :  { %v4210_v43 = vpop.eup %4209 }
0x1910   :  { %v2978_v44 = vmul.f32 %v4210_v43, %v2767_v42 }
0x1911   :  { %v4212_v46 = vpop.eup %4211 }
0x1912   :  { %v2979_v45 = vadd.f32 %v2978_v44, %v2960_v61  ;;  %v2981_v48 = vsub.f32 1.0, %v4212_v46  ;;  %v2983_v26 = vmul.f32 %v4212_v46, %v5056_v54 }
0x1914   :  { %4213 = vtanh.f32 %v2979_v45 }
0x1921   :  { %v4214_v24 = vpop.eup %4213 }
0x1922   :  { %v2982_v25 = vmul.f32 %v4214_v24, %v2981_v48 }
0x1924   :  { %v5122_v27 = vadd.f32 %v2983_v26, %v2982_v25 }
0x1926   :  { %3930 = vmatmul.mubr.msk.f32.vlgmr.msra.gmra.mxu0 %vm146_vm0, %v5122_v27  ;;  %3931 = vmatmul.mubr.msk.f32.vlgmr.msra.gmra.mxu1 %vm146_vm0, %v5122_v27 }
0x1927   :  { %3209 = vmatpush1.msra.mxu0 %v4874_v50  ;;  %4089 = vmatpush3.msra.mxu1 %v4989_v62 }
0x1928   :  { %3210 = vmatprep.subr.mxu0 %v4878_v36  ;;  %4090 = vmatprep.subr.mxu1 %v4397_v0 }
0x1929   :  { %3211 = vmatpush1.msra.mxu0 %v4882_v51  ;;  %4091 = vmatpush3.msra.mxu1 %v4995_v49 }
0x192a   :  { %3212 = vmatprep.subr.mxu0 %v4886_v17  ;;  %4092 = vmatprep.subr.mxu1 %v4397_v0 }
0x192b   :  { %3213 = vmatpush1.msra.mxu0 %v4890_v20  ;;  %4093 = vmatpush3.msra.mxu1 %v5001_v63 }
0x192c   :  { %3214 = vmatprep.subr.mxu0 %v4894_v28  ;;  %4094 = vmatprep.subr.mxu1 %v4397_v0 }
0x192d   :  { %3215 = vmatpush1.msra.mxu0 %v4898_v22  ;;  %3248 = vmatprep.mubr.f32.mxu0 %v4397_v0 }
0x192e   :  { %4095 = vmatpush3.msra.mxu1 %v5008_v9  ;;  %4096 = vmatprep.mubr.msk.f32.mxu1 %vm4398_vm2, %v4397_v0 }
0x192f   :  { %3373 = vmatprep.subr.mxu0 %v4905_v30  ;;  %3444 = vmatprep.subr.mxu1 %v4908_v31 }
0x19e6   :  { %v3054_v54 = vpop.f32.mrf.mxu0 }
0x19e7   :  { %v3055_v32 = vadd.f32 %v3054_v54, %v4624_v39 }
0x19e9   :  { %v3130_v58 = vsel %vm601_vm3, %v3055_v32, -inf }
0x19ea   :  { %3131 = vmax.xlane.f32.xlu1 %v3130_v58 }
0x1a73   :  { %v3132_v52 = vpop.xlane.xlu1 %3131 }
0x1a74   :  { %vm3133_vm14 = vcmp.eq.f32.partialorder %v3055_v32, %v3132_v52  ;;  %v3153_v53 = vsub.f32 %v3055_v32, %v3132_v52 }
0x1a75   :  { %v3134_v1 = vsel %vm3133_vm14, %v4504_v19, 32 }
0x1a76   :  { %v3161_v7 = vrot.slane %v3153_v53, %v4629_v47  ;;  %v3135_v61 = vsel %vm601_vm3, %v3134_v1, 2147483647 }
0x1a77   :  { %v3137_v55 = vshra.s32 %v3135_v61, 16  ;;  %v3136_v29 = vand.u32 65535, %v3135_v61 }
0x1a78   :  { %v3162_v56 = vcombine.high %v3161_v7, %v3161_v7  ;;  %v3169_v30 = vrot.slane %v3161_v7, %v4629_v47 }
0x1a79   :  { %v3139_v31 = vcvt.s32.f32 %v3137_v55  ;;  %v3138_v60 = vcvt.s32.f32 %v3136_v29 }
0x1a7a   :  { %v3176_v33 = vrot.slane %v3162_v56, %v4629_v47  ;;  %3179 = vst.msk [vmem:[%s5298_s6 + $0x7] sm:$0x1] %vm651_vm5, %v3169_v30 }
0x1a7b   :  { %3140 = vmin.xlane.f32.xlu0 %v3139_v31 }
0x1a7c   :  { %3180 = vst.msk [vmem:[%s5298_s6 + $0x17] sm:$0x1] %vm651_vm5, %v3176_v33 }
0x1a83   :  { %v3813_v61 = vld [vmem:[%s5298_s6 + $0x10] sm:$0xff] }
0x1a84   :  { %v3819_v55 = vmul.f32 1.442695, %v3813_v61 }
0x1b04   :  { %v3141_v59 = vpop.xlane.xlu0 %3140 }
0x1b05   :  { %vm3142_vm15 = vcmp.eq.f32.partialorder %v3139_v31, %v3141_v59  ;;  %v3147_v3 = vcvt.f32.s32 %v3141_v59 }
0x1b06   :  { %v3143_v2 = vsel %vm3142_vm15, %v3138_v60, inf }
0x1b07   :  { %3144 = vmin.xlane.f32.xlu1 %v3143_v2  ;;  %v3148_v15 = vshll.u32 %v3147_v3, 16 }
0x1b90   :  { %v3145_v35 = vpop.xlane.xlu1 %3144 }
0x1b91   :  { %v3146_v40 = vcvt.f32.s32 %v3145_v35 }
0x1b93   :  { %v3149_v42 = vadd.s32 %v3148_v15, %v3146_v40 }
0x1b95   :  { %vm3150_vm1 = vcmp.eq.s32.totalorder %v4504_v19, %v3149_v42 }
0x1b96   :  { %v3932_v43 = vsel %vm3150_vm1, 1.0, %v4397_v0 }
0x1b97   :  { %3933 = vmatmul.mubr.msk.f32.vlgmr.msra.gmra.mxu0 %vm146_vm0, %v3932_v43  ;;  %4097 = vmatmul.mubr.msk.f32.vlgmr.msra.gmra.mxu1 %vm146_vm0, %v3932_v43 }
0x1b98   :  { %3374 = vmatpush1.msra.mxu0 %v4930_v4  ;;  %3445 = vmatpush1.msra.mxu1 %v4933_v5  ;;  %v3125_v4 = vpop.f32.mrf.mxu1  ;;  %v3056_v5 = vpop.f32.mrf.mxu0 }
0x1b99   :  { %3375 = vmatprep.subr.mxu0 %v4936_v6  ;;  %3446 = vmatprep.subr.mxu1 %v4939_v8  ;;  %v3057_v8 = vadd.f32 %v3056_v5, %v4586_v37 }
0x1b9a   :  { %3376 = vmatpush1.msra.mxu0 %v4942_v10  ;;  %3447 = vmatpush1.msra.mxu1 %v4945_v11  ;;  %v3127_v6 = vpop.f32.mrf.mxu1 }
0x1b9b   :  { %3377 = vmatprep.subr.mxu0 %v4948_v12  ;;  %3448 = vmatprep.subr.mxu1 %v4951_v13  ;;  %v3128_v46 = vadd.f32 %v3127_v6, %v4594_v57 }
0x1b9c   :  { %3378 = vmatpush1.msra.mxu0 %v4954_v14  ;;  %3449 = vmatpush1.msra.mxu1 %v4957_v18 }
0x1b9d   :  { %3379 = vmatprep.subr.mxu0 %v4960_v21  ;;  %3450 = vmatprep.subr.mxu1 %v4963_v16  ;;  %v3126_v21 = vadd.f32 %v3125_v4, %v4590_v41 }
0x1b9e   :  { %3380 = vmatpush1.msra.mxu0 %v4966_v23  ;;  %3413 = vmatprep.mubr.f32.mxu0 %v4397_v0 }
0x1b9f   :  { %3451 = vmatpush1.msra.mxu1 %v4970_v38  ;;  %3484 = vmatprep.mubr.f32.mxu1 %v4397_v0 }
0x1ba0   :  { %3569 = vmatprep.subr.mxu0 %v4974_v34  ;;  %4099 = vmatprep.subr.mxu1 %v4397_v0 }
0x1c57   :  { %v3250_v10 = vpop.f32.mrf.mxu0  ;;  %v3321_v11 = vpop.f32.mrf.mxu1 }
0x1c58   :  { %v3325_v12 = vadd.f32 %v3250_v10, %v3057_v8 }
0x1c59   :  { %v4098_v13 = vpop.f32.mrf.mxu1  ;;  %v3252_v18 = vpop.f32.mrf.mxu0 }
0x1c5a   :  { %v3935_v14 = vmul.f32 -1.442695, %v3325_v12  ;;  %v3326_v16 = vadd.f32 %v3252_v18, %v3126_v21  ;;  %v110_v13 = vld [vmem:[#allocation8 + $0x18] sm:$0xff]  ;;  %v108_v18 = vld [vmem:[#allocation8 + $0x8] sm:$0xff]  ;;  %v107_v21 = vld [vmem:[#allocation8] sm:$0xff] }
0x1c5c   :  { %4215 = vpow2.f32 %v3935_v14  ;;  %v3936_v23 = vmul.f32 -1.442695, %v3326_v16  ;;  %v109_v14 = vld [vmem:[#allocation8 + $0x10] sm:$0xff] }
0x1c5e   :  { %4217 = vpow2.f32 %v3936_v23 }
0x1c69   :  { %v4216_v38 = vpop.eup %4215 }
0x1c6a   :  { %v3333_v34 = vadd.f32 1.0, %v4216_v38 }
0x1c6b   :  { %v4218_v44 = vpop.eup %4217 }
0x1c6c   :  { %4219 = vrcp.f32 %v3333_v34  ;;  %v3334_v45 = vadd.f32 1.0, %v4218_v44 }
0x1c6e   :  { %4221 = vrcp.f32 %v3334_v45 }
0x1c79   :  { %v4220_v48 = vpop.eup %4219 }
0x1c7a   :  { %v3339_v24 = vmul.f32 %v4220_v48, %v3128_v46 }
0x1c7b   :  { %v4222_v26 = vpop.eup %4221 }
0x1c7c   :  { %v3340_v25 = vadd.f32 %v3339_v24, %v3321_v11  ;;  %v3342_v54 = vsub.f32 1.0, %v4222_v26  ;;  %v3344_v52 = vmul.f32 %v4222_v26, %v5122_v27 }
0x1c7e   :  { %4223 = vtanh.f32 %v3340_v25 }
0x1c8b   :  { %v4224_v32 = vpop.eup %4223 }
0x1c8c   :  { %v3343_v58 = vmul.f32 %v4224_v32, %v3342_v54 }
0x1c8e   :  { %v5188_v53 = vadd.f32 %v3344_v52, %v3343_v58 }
0x1c90   :  { %3937 = vmatmul.mubr.msk.f32.vlgmr.msra.gmra.mxu0 %vm146_vm0, %v5188_v53  ;;  %3938 = vmatmul.mubr.msk.f32.vlgmr.msra.gmra.mxu1 %vm146_vm0, %v5188_v53 }
0x1c91   :  { %3570 = vmatpush1.msra.mxu0 %v4874_v50  ;;  %4100 = vmatpush3.msra.mxu1 %v4989_v62 }
0x1c92   :  { %3571 = vmatprep.subr.mxu0 %v4878_v36  ;;  %4101 = vmatprep.subr.mxu1 %v4397_v0 }
0x1c93   :  { %3572 = vmatpush1.msra.mxu0 %v4882_v51  ;;  %4102 = vmatpush3.msra.mxu1 %v4995_v49 }
0x1c94   :  { %3573 = vmatprep.subr.mxu0 %v4886_v17  ;;  %4103 = vmatprep.subr.mxu1 %v4397_v0 }
0x1c95   :  { %3574 = vmatpush1.msra.mxu0 %v4890_v20  ;;  %4104 = vmatpush3.msra.mxu1 %v5001_v63 }
0x1c96   :  { %3575 = vmatprep.subr.mxu0 %v4894_v28  ;;  %4105 = vmatprep.subr.mxu1 %v4397_v0 }
0x1c97   :  { %3576 = vmatpush1.msra.mxu0 %v4898_v22  ;;  %3609 = vmatprep.mubr.f32.mxu0 %v4397_v0 }
0x1c98   :  { %4106 = vmatpush3.msra.mxu1 %v5008_v9  ;;  %4107 = vmatprep.mubr.msk.f32.mxu1 %vm4398_vm2, %v4397_v0 }
0x1c99   :  { %4110 = vmatprep.subr.mxu0 %v4397_v0 }
0x1d50   :  { %v3415_v50 = vpop.f32.mrf.mxu0  ;;  %v3486_v16 = vpop.f32.mrf.mxu1 }
0x1d51   :  { %v3416_v36 = vadd.f32 %v3415_v50, %v4624_v39  ;;  %v3811_v39 = vld [vmem:[%s5298_s6] sm:$0xff]  ;;  %v3487_v26 = vadd.f32 %v3486_v16, %v4590_v41 }
0x1d52   :  { %v3815_v7 = vmul.f32 1.442695, %v3811_v39  ;;  %v3417_v23 = vpop.f32.mrf.mxu0  ;;  %v3488_v38 = vpop.f32.mrf.mxu1 }
0x1d53   :  { %v3491_v51 = vsel %vm601_vm3, %v3416_v36, -inf  ;;  %v3418_v34 = vadd.f32 %v3417_v23, %v4586_v37 }
0x1d54   :  { %3492 = vmax.xlane.f32.xlu0 %v3491_v51  ;;  %4225 = vpow2.f32 %v3815_v7 }
0x1d55   :  { %4227 = vpow2.f32 %v3819_v55 }
0x1d61   :  { %v4226_v29 = vpop.eup %4225 }
0x1d62   :  { %v3823_v59 = vsel %vm146_vm0, %v4226_v29, 0.0  ;;  %v4228_v60 = vpop.eup %4227 }
0x1d63   :  { %v3829_v2 = vsel %vm146_vm0, %v4228_v60, 0.0 }
0x1ddd   :  { %v3493_v17 = vpop.xlane.xlu0 %3492 }
0x1dde   :  { %vm3494_vm4 = vcmp.eq.f32.partialorder %v3416_v36, %v3493_v17  ;;  %v3514_v20 = vsub.f32 %v3416_v36, %v3493_v17  ;;  %v3489_v36 = vadd.f32 %v3488_v38, %v4594_v57  ;;  %v3873_v57 = vld [vmem:[%s5296_s4] ss:$0 sm:$0xff] }
0x1ddf   :  { %v3495_v28 = vsel %vm3494_vm4, %v4504_v19, 32 }
0x1de0   :  { %v3522_v22 = vrot.slane %v3514_v20, %v4629_v47  ;;  %v3496_v62 = vsel %vm601_vm3, %v3495_v28, 2147483647 }
0x1de1   :  { %v3498_v49 = vshra.s32 %v3496_v62, 16  ;;  %v3497_v56 = vand.u32 65535, %v3496_v62 }
0x1de2   :  { %v3523_v63 = vcombine.high %v3522_v22, %v3522_v22  ;;  %v3530_v9 = vrot.slane %v3522_v22, %v4629_v47 }
0x1de3   :  { %v3500_v27 = vcvt.s32.f32 %v3498_v49  ;;  %v3499_v31 = vcvt.s32.f32 %v3497_v56 }
0x1de4   :  { %v3537_v1 = vrot.slane %v3523_v63, %v4629_v47  ;;  %3540 = vst.msk [vmem:[%s5298_s6 + $0x8] sm:$0x1] %vm651_vm5, %v3530_v9 }
0x1de5   :  { %3501 = vmin.xlane.f32.xlu1 %v3500_v27 }
0x1de6   :  { %3541 = vst.msk [vmem:[%s5298_s6 + $0x18] sm:$0x1] %vm651_vm5, %v3537_v1 }
0x1e6e   :  { %v3502_v30 = vpop.xlane.xlu1 %3501 }
0x1e6f   :  { %vm3503_vm6 = vcmp.eq.f32.partialorder %v3500_v27, %v3502_v30  ;;  %v3508_v3 = vcvt.f32.s32 %v3502_v30 }
0x1e70   :  { %v3504_v33 = vsel %vm3503_vm6, %v3499_v31, inf }
0x1e71   :  { %3505 = vmin.xlane.f32.xlu0 %v3504_v33  ;;  %v3509_v15 = vshll.u32 %v3508_v3, 16 }
0x1e75   :  { %3824 = vadd.xlane.f32.xlu0 %v3823_v59 }
0x1e79   :  { %3830 = vadd.xlane.f32.xlu0 %v3829_v2 }
0x1efa   :  { %v3506_v35 = vpop.xlane.xlu0 %3505 }
0x1efb   :  { %v3507_v40 = vcvt.f32.s32 %v3506_v35 }
0x1efd   :  { %v3510_v42 = vadd.s32 %v3509_v15, %v3507_v40 }
0x1efe   :  { %v3825_v43 = vpop.xlane.xlu0 %3824 }
0x1eff   :  { %vm3511_vm7 = vcmp.eq.s32.totalorder %v4504_v19, %v3510_v42  ;;  %4229 = vlog2.f32 %v3825_v43 }
0x1f00   :  { %v3939_v4 = vsel %vm3511_vm7, 1.0, %v4397_v0 }
0x1f01   :  { %3940 = vmatmul.mubr.msk.f32.vlgmr.msra.gmra.mxu0 %vm146_vm0, %v3939_v4  ;;  %4108 = vmatmul.mubr.msk.f32.vlgmr.msra.gmra.mxu1 %vm146_vm0, %v3939_v4 }
0x1f02   :  { %v3831_v5 = vpop.xlane.xlu0 %3830  ;;  %4118 = vmatprep.mubr.msk.f32.mxu0 %vm4398_vm2, %v4397_v0  ;;  %4111 = vmatpush3.msra.mxu0 %v110_v13 }
0x1f03   :  { %4231 = vlog2.f32 %v3831_v5  ;;  %4112 = vmatprep.subr.mxu0 %v4397_v0 }
0x1f04   :  { %4113 = vmatpush3.msra.mxu0 %v109_v14 }
0x1f05   :  { %4114 = vmatprep.subr.mxu0 %v4397_v0 }
0x1f06   :  { %4115 = vmatpush3.msra.mxu0 %v108_v18 }
0x1f07   :  { %4116 = vmatprep.subr.mxu0 %v4397_v0 }
0x1f08   :  { %4117 = vmatpush3.msra.mxu0 %v107_v21 }
0x1f0c   :  { %v4230_v6 = vpop.eup %4229 }
0x1f0d   :  { %v3836_v8 = vmul.f32 0.6931472, %v4230_v6 }
0x1f0f   :  { %v3843_v10 = vsub.f32 %v3811_v39, %v3836_v8 }
0x1f10   :  { %v4232_v11 = vpop.eup %4231 }
0x1f11   :  { %3847 = vst.msk [vmem:[%s5298_s6] sm:$0xff] %vm146_vm0, %v3843_v10  ;;  %v3840_v19 = vmul.f32 0.6931472, %v4232_v11 }
0x1f13   :  { %v3845_v12 = vsub.f32 %v3813_v61, %v3840_v19 }
0x1f15   :  { %3849 = vst.msk [vmem:[%s5298_s6 + $0x10] sm:$0xff] %vm146_vm0, %v3845_v12 }
0x1fc1   :  { %v3611_v44 = vpop.f32.mrf.mxu0  ;;  %v3682_v45 = vpop.f32.mrf.mxu1 }
0x1fc2   :  { %v3686_v46 = vadd.f32 %v3611_v44, %v3418_v34 }
0x1fc3   :  { %v4109_v48 = vpop.f32.mrf.mxu1  ;;  %v3613_v25 = vpop.f32.mrf.mxu0 }
0x1fc4   :  { %v3942_v24 = vmul.f32 -1.442695, %v3686_v46  ;;  %v3687_v54 = vadd.f32 %v3613_v25, %v3487_v26 }
0x1fc6   :  { %4233 = vpow2.f32 %v3942_v24  ;;  %v3943_v32 = vmul.f32 -1.442695, %v3687_v54 }
0x1fc8   :  { %4235 = vpow2.f32 %v3943_v32 }
0x1fd3   :  { %v4234_v58 = vpop.eup %4233 }
0x1fd4   :  { %v3694_v0 = vadd.f32 1.0, %v4234_v58 }
0x1fd5   :  { %v4236_v52 = vpop.eup %4235 }
0x1fd6   :  { %4237 = vrcp.f32 %v3694_v0  ;;  %v3695_v50 = vadd.f32 1.0, %v4236_v52 }
0x1fd8   :  { %4239 = vrcp.f32 %v3695_v50 }
0x1fe3   :  { %v4238_v37 = vpop.eup %4237 }
0x1fe4   :  { %v3700_v51 = vmul.f32 %v4238_v37, %v3489_v36 }
0x1fe5   :  { %v4240_v20 = vpop.eup %4239 }
0x1fe6   :  { %v3701_v17 = vadd.f32 %v3700_v51, %v3682_v45  ;;  %v3703_v28 = vsub.f32 1.0, %v4240_v20  ;;  %v3705_v62 = vmul.f32 %v4240_v20, %v5188_v53 }
0x1fe8   :  { %4241 = vtanh.f32 %v3701_v17 }
0x1ff5   :  { %v4242_v22 = vpop.eup %4241 }
0x1ff6   :  { %v3704_v41 = vmul.f32 %v4242_v22, %v3703_v28 }
0x1ff8   :  { %v3706_v49 = vadd.f32 %v3705_v62, %v3704_v41 }
0x1ffa   :  { %4119 = vmatmul.mubr.msk.f32.vlgmr.msra.gmra.mxu0 %vm146_vm0, %v3706_v49  ;;  %3851 = vst.msk [vmem:[#allocation10] sm:$0x3] %vm601_vm3, %v3706_v49 }
0x20ba   :  { %v3776_v63 = vpop.f32.mrf.mxu0 }
0x20bb   :  { %v3777_v9 = vadd.f32 %v3873_v57, %v3776_v63 }
0x20bc   :  { %v4120_v27 = vpop.f32.mrf.mxu0 }
0x20bd   :  { %v3780_v1 = vsel %vm601_vm3, %v3777_v9, -inf }
0x20be   :  { %3781 = vmax.xlane.f32.xlu1 %v3780_v1 }
0x2147   :  { %v3782_v39 = vpop.xlane.xlu1 %3781 }
0x2148   :  { %v3783_v7 = vsub.f32 %v3777_v9, %v3782_v39 }
0x214a   :  { %v3791_v61 = vrot.slane %v3783_v7, %v4629_v47 }
0x214c   :  { %v3792_v53 = vcombine.high %v3791_v61, %v3791_v61  ;;  %v3799_v55 = vrot.slane %v3791_v61, %v4629_v47 }
0x214e   :  { %v3806_v56 = vrot.slane %v3792_v53, %v4629_v47  ;;  %3809 = vst.msk [vmem:[%s5298_s6 + $0x9] sm:$0x1] %vm651_vm5, %v3799_v55 }
0x2150   :  { %3810 = vst.msk [vmem:[%s5298_s6 + $0x19] sm:$0x1] %vm651_vm5, %v3806_v56 }
0x2155   :  { %v3812_v30 = vld [vmem:[%s5298_s6 + $0x8] sm:$0x3] }
0x2156   :  { %v3817_v31 = vmul.f32 1.442695, %v3812_v30 }
0x2157   :  { %v3814_v33 = vld [vmem:[%s5298_s6 + $0x18] sm:$0x3] }
0x2158   :  { %4243 = vpow2.f32 %v3817_v31  ;;  %v3821_v47 = vmul.f32 1.442695, %v3814_v33 }
0x215a   :  { %4245 = vpow2.f32 %v3821_v47 }
0x2165   :  { %v4244_v29 = vpop.eup %4243 }
0x2166   :  { %v3826_v59 = vsel %vm601_vm3, %v4244_v29, 0.0 }
0x2167   :  { %v4246_v60 = vpop.eup %4245  ;;  %3827 = vadd.xlane.f32.xlu1 %v3826_v59 }
0x2168   :  { %v3832_v2 = vsel %vm601_vm3, %v4246_v60, 0.0 }
0x216b   :  { %3833 = vadd.xlane.f32.xlu1 %v3832_v2 }
0x216c   :  { %4370 = shalt.err (!%p4367_p10)
}
0x216d   :  { %3863 = dma.vmem_to_hbm [thread:$0]  %s3861_s2, 32, %s5299_s7, [#allocation4]  }
0x21f0   :  { %v3828_v3 = vpop.xlane.xlu1 %3827 }
0x21f1   :  { %4247 = vlog2.f32 %v3828_v3 }
0x21f4   :  { %v3834_v35 = vpop.xlane.xlu1 %3833 }
0x21f5   :  { %4249 = vlog2.f32 %v3834_v35 }
0x21fe   :  { %v4248_v15 = vpop.eup %4247 }
0x21ff   :  { %v3838_v40 = vmul.f32 0.6931472, %v4248_v15 }
0x2201   :  { %v3844_v42 = vsub.f32 %v3812_v30, %v3838_v40 }
0x2202   :  { %v4250_v43 = vpop.eup %4249 }
0x2203   :  { %3848 = vst.msk [vmem:[%s5298_s6 + $0x8] sm:$0x3] %vm601_vm3, %v3844_v42  ;;  %v3842_v4 = vmul.f32 0.6931472, %v4250_v43 }
0x2205   :  { %v3846_v5 = vsub.f32 %v3814_v33, %v3842_v4 }
0x2207   :  { %3850 = vst.msk [vmem:[%s5298_s6 + $0x18] sm:$0x3] %vm601_vm3, %v3846_v5 }
0x2208   :  { %4385 = dma.done.wait [#allocation4], 32  }
0x2209   :  { %4386 = vsyncadd [#allocation4], 4294967264 }
0x220a   :  { %3869 = vsyncpa [#allocation3], 1 }
0x220b   :  { %3870 = vsyncpa [#allocation6], 1 }
0x220c   :  { %3871 = vsyncpa [#allocation9], 1 }
0x220d   :  { %3872 = vsyncpa [#allocation4], 1 }

</bundles_post_ra>
